<compile_context>
chip_gen: v7x
topology: tpu7x:2x2x1
jax: 0.10.0
libtpu: 0.0.40
codegen_flags: <defaults>
</compile_context>

<pallas_src>
import functools

import jax
import jax.numpy as jnp
from jax.experimental import pallas as pl
from jax.experimental.pallas import tpu as pltpu


def _round_up(x, m):
    return ((x + m - 1) // m) * m


def _vmem_limit_bytes(payload_bytes):
    """Scoped-VMEM request derived from actual buffer sizes (+20% and 4 MiB slack)."""
    return int(min(max(int(payload_bytes * 1.2) + (4 << 20), 32 << 20), 100 << 20))


def _resident_spec(block_shape, index_map):
    """Grid-invariant operand: single-buffered if this Pallas version supports it."""
    try:
        return pl.BlockSpec(block_shape, index_map, pipeline_mode=pl.Buffered(1))
    except Exception:   # older Pallas without pipeline_mode / Buffered(1)
        return pl.BlockSpec(block_shape, index_map)


# ----------------------------------------------------------------------------------
# Phase 1: GRU + attention recurrence.  grid = (T,)
# ----------------------------------------------------------------------------------
def _nmt_recurrence_kernel(emb_ref, enc_ref, enc_out_ref,
                           w_map_ref, b_map_ref,
                           w_i_ref, b_i_ref, w_hh_ref, b_h_ref,
                           state_ref,
                           h_scr, ctx_scr):
    t = pl.program_id(0)
    H = h_scr.shape[1]                     # padded hidden size
    f32 = jnp.float32
    mm_dt = w_i_ref.dtype                  # matmul operand dtype (bf16 by default)

    # ---- one-time init: h0 = encoder_map(encoder_output), context = 0 ------------
    @pl.when(t == 0)
    def _init():
        h_scr[...] = (jnp.dot(enc_out_ref[...], w_map_ref[...],
                              preferred_element_type=f32) + b_map_ref[...])
        ctx_scr[...] = jnp.zeros_like(ctx_scr)

    x = emb_ref[t]                         # [B_p, E_p]   (resident block, dyn. index)
    h = h_scr[...]                         # [B_p, H]     f32
    ctx = ctx_scr[...]                     # [B_p, H]     f32

    # Fused GRU: rnn_input = cat([emb, ctx]) -> single dot; gates r|z|n on lane axis.
    xin = jnp.concatenate([x, ctx.astype(mm_dt)], axis=1)          # [B_p, E_p+H]
    gi = (jnp.dot(xin, w_i_ref[...], preferred_element_type=f32)
          + b_i_ref[...])                                           # [B_p, 3H]
    gh = (jnp.dot(h.astype(mm_dt), w_hh_ref[...], preferred_element_type=f32)
          + b_h_ref[...])                                           # [B_p, 3H]
    r = jax.nn.sigmoid(gi[:, :H] + gh[:, :H])
    z = jax.nn.sigmoid(gi[:, H:2 * H] + gh[:, H:2 * H])
    n = jnp.tanh(gi[:, 2 * H:] + r * gh[:, 2 * H:])
    h_new = (1.0 - z) * n + z * h                                   # [B_p, H]

    # terse_attention on the VPU/XLU (B is small, so M=1 MXU passes would waste rows):
    # scores_bs = sum_h enc_bsh * h_bh ;  softmax over s ;  ctx_bh = sum_s p_bs * enc_bsh
    enc = enc_ref[...].astype(f32)                                  # [B_p, S, H]
    q = h_new.astype(mm_dt).astype(f32)[:, None, :]                 # bf16-round like MXU
    scores = jnp.sum(enc * q, axis=-1, keepdims=True)               # [B_p, S, 1]
    m = jnp.max(scores, axis=1, keepdims=True)
    e = jnp.exp(scores - m)
    p = e * pl.reciprocal(jnp.sum(e, axis=1, keepdims=True), approx=True)
    ctx_new = jnp.sum(p * enc, axis=1)                              # [B_p, H]

    h_scr[...] = h_new
    ctx_scr[...] = ctx_new
    # classifier input for this step: cat([ctx, h]) (matches the PyTorch cat order).
    state_ref[0] = jnp.concatenate([ctx_new, h_new], axis=1).astype(state_ref.dtype)


# ----------------------------------------------------------------------------------
# Phase 2: batched classifier.  grid = (n_v, n_t), both parallel.
# ----------------------------------------------------------------------------------
def _nmt_classifier_kernel(state_ref, w_ref, b_ref, out_ref, *, state_resident=True):
    Bp, tt, _ = out_ref.shape              # output block: [B_p, tt, V_blk]

    if state_resident:
        ti = pl.program_id(1)
        start = pl.multiple_of(ti * tt, tt)
        blk = state_ref[pl.ds(start, tt), :, :]        # [tt, B_p, 2H_p]
    else:
        blk = state_ref[...]                           # [tt, B_p, 2H_p]

    # (t, b, 2H) -> (b*tt + t, 2H): b-major rows, so the result maps straight onto the
    # [B_p, tt, V_blk] output block (no wrapper-side [T,B,V] -> [B,T,V] HBM permute).
    xin = jnp.concatenate([blk[:, b, :] for b in range(Bp)], axis=0)   # [B_p*tt, 2H_p]

    logits = (jnp.dot(xin, w_ref[...], preferred_element_type=jnp.float32)
              + b_ref[...])                                            # [B_p*tt, V_blk]
    out_ref[...] = logits.reshape(Bp, tt, -1)


# ----------------------------------------------------------------------------------
# Wrapper
# ----------------------------------------------------------------------------------
def nmt_decoder_forward(params, encoder_states, encoder_output, target_sequence,
                        *, matmul_dtype=jnp.bfloat16, v_block=1024):
    B, S, H = encoder_states.shape
    T = target_sequence.shape[1]
    V, E = params["emb"].shape

    f32 = jnp.float32
    mm_dt = matmul_dtype
    msz = jnp.dtype(mm_dt).itemsize

    B_p = _round_up(B, 8)
    H_p = _round_up(H, 128)
    E_p = _round_up(E, 128)
    v_block = _round_up(v_block, 128)
    V_blk = min(v_block, _round_up(V, 128))
    V_p = _round_up(V, V_blk)
    n_v = V_p // V_blk

    def pad2(x, r, c):
        return jnp.pad(x, ((0, r - x.shape[0]), (0, c - x.shape[1])))

    # ---------------- host-side prep (XLA glue) -----------------------------------
    emb_x = jnp.transpose(params["emb"][target_sequence], (1, 0, 2))       # [T, B, E]
    emb_x = jnp.pad(emb_x, ((0, 0), (0, B_p - B), (0, E_p - E))).astype(mm_dt)

    enc = jnp.pad(encoder_states, ((0, B_p - B), (0, 0), (0, H_p - H))).astype(mm_dt)
    enc_out = jnp.pad(encoder_output, ((0, B_p - B), (0, H_p - H))).astype(mm_dt)

    w_map = pad2(params["w_map"], H_p, H_p).astype(mm_dt)
    b_map = pad2(params["b_map"], 1, H_p).astype(f32)

    # GRU gates fused r|z|n along the output (lane) axis; emb- and ctx- halves of W_ih
    # fused along the input axis (matches rnn_input = cat([emb, ctx])).
    def fuse_gates(w3, rows):
        return jnp.concatenate([pad2(w3[g], rows, H_p) for g in range(3)], axis=1)

    w_i = jnp.concatenate([fuse_gates(params["wie"], E_p),
                           fuse_gates(params["wic"], H_p)], axis=0).astype(mm_dt)
    w_hh = fuse_gates(params["whh"], H_p).astype(mm_dt)
    b_i = fuse_gates(params["bih"], 1).astype(f32)
    b_h = fuse_gates(params["bhh"], 1).astype(f32)

    # Classifier on cat([ctx, h]): fuse the two halves along the input (K) axis.
    w_cls = jnp.concatenate([pad2(params["wcls_c"], H_p, V_p),
                             pad2(params["wcls_h"], H_p, V_p)], axis=0).astype(mm_dt)
    b_cls = pad2(params["b_cls"], 1, V_p).astype(f32)

    # ---------------- phase 1: recurrence ------------------------------------------
    c2 = lambda t: (0, 0)
    c3 = lambda t: (0, 0, 0)
    p1_in_specs = [
        _resident_spec((T, B_p, E_p), c3),              # embeddings (fully resident)
        _resident_spec((B_p, S, H_p), c3),              # encoder states
        _resident_spec((B_p, H_p), c2),                 # encoder output
        _resident_spec((H_p, H_p), c2),                 # encoder_map W
        _resident_spec((1, H_p), c2),                   # encoder_map b
        _resident_spec((E_p + H_p, 3 * H_p), c2),       # GRU W_ih (emb|ctx fused)
        _resident_spec((1, 3 * H_p), c2),               # GRU b_ih
        _resident_spec((H_p, 3 * H_p), c2),             # GRU W_hh
        _resident_spec((1, 3 * H_p), c2),               # GRU b_hh
    ]
    p1_out_spec = pl.BlockSpec((1, B_p, 2 * H_p), lambda t: (t, 0, 0))

    p1_bytes = ((T * B_p * E_p + B_p * S * H_p + B_p * H_p + H_p * H_p
                 + (E_p + H_p) * 3 * H_p + H_p * 3 * H_p) * msz
                + (8 * H_p + 2 * 8 * 3 * H_p) * 4        # biases (sublane padded)
                + 2 * B_p * 2 * H_p * msz                # double-buffered state out
                + 2 * B_p * H_p * 4)                     # scratch

    state = pl.pallas_call(
        _nmt_recurrence_kernel,
        out_shape=jax.ShapeDtypeStruct((T, B_p, 2 * H_p), mm_dt),
        grid_spec=pltpu.PrefetchScalarGridSpec(
            num_scalar_prefetch=0,
            grid=(T,),
            in_specs=p1_in_specs,
            out_specs=p1_out_spec,
            scratch_shapes=[pltpu.VMEM((B_p, H_p), f32),      # h_t
                            pltpu.VMEM((B_p, H_p), f32)]),    # context vectors
        compiler_params=pltpu.CompilerParams(
            dimension_semantics=("arbitrary",),               # sequential recurrence
            vmem_limit_bytes=_vmem_limit_bytes(p1_bytes)),
    )(emb_x, enc, enc_out, w_map, b_map, w_i, b_i, w_hh, b_h)

    # ---------------- phase 2: batched classifier ----------------------------------
    if T <= 8:
        tt = T                                            # block = full T (allowed)
    else:
        tt = min(_round_up(max(1, 256 // B_p), 8), _round_up(T, 8))
    T_p = _round_up(T, tt)
    n_t = T_p // tt
    if T_p > T:
        state = jnp.pad(state, ((0, T_p - T), (0, 0), (0, 0)))

    state_bytes = T_p * B_p * 2 * H_p * msz
    resident_state = state_bytes <= (16 << 20)
    if resident_state:
        state_spec = _resident_spec((T_p, B_p, 2 * H_p), lambda vi, ti: (0, 0, 0))
        p2_state_bytes = state_bytes
    else:
        state_spec = pl.BlockSpec((tt, B_p, 2 * H_p), lambda vi, ti: (ti, 0, 0))
        p2_state_bytes = 2 * tt * B_p * 2 * H_p * msz

    p2_in_specs = [
        state_spec,
        pl.BlockSpec((2 * H_p, V_blk), lambda vi, ti: (0, vi)),   # outer axis only ->
        pl.BlockSpec((1, V_blk), lambda vi, ti: (0, vi)),         # weights streamed ONCE
    ]
    p2_out_spec = pl.BlockSpec((B_p, tt, V_blk), lambda vi, ti: (0, ti, vi))

    p2_bytes = (p2_state_bytes
                + 2 * (2 * H_p) * V_blk * msz + 2 * 8 * V_blk * 4
                + 2 * B_p * tt * V_blk * 4)

    logits = pl.pallas_call(
        functools.partial(_nmt_classifier_kernel, state_resident=resident_state),
        out_shape=jax.ShapeDtypeStruct((B_p, T_p, V_p), f32),
        grid_spec=pltpu.PrefetchScalarGridSpec(
            num_scalar_prefetch=0,
            grid=(n_v, n_t),
            in_specs=p2_in_specs,
            out_specs=p2_out_spec),
        compiler_params=pltpu.CompilerParams(
            dimension_semantics=("parallel", "parallel"),    # dual-TC friendly (v7x)
            vmem_limit_bytes=_vmem_limit_bytes(p2_bytes)),
    )(state, w_cls, b_cls)

    return logits[:B, :T, :V]                                 # [B, T, V]


# ----------------------------------------------------------------------------------
# Parameters + pure-JAX reference (unfused, validates the fused kernel layout).
# ----------------------------------------------------------------------------------
def init_params(key, num_embeddings, embedding_size, rnn_hidden_size):
    V, E, H = num_embeddings, embedding_size, rnn_hidden_size
    ks = jax.random.split(key, 11)

    def u(k, shape, bound):
        return jax.random.uniform(k, shape, jnp.float32, minval=-bound, maxval=bound)

    emb = jax.random.normal(ks[0], (V, E), jnp.float32)
    emb = emb.at[0].set(0.0)                       # padding_idx=0 row is zero

    bH = 1.0 / (H ** 0.5)
    b2H = 1.0 / ((2 * H) ** 0.5)
    return {
        "emb": emb,
        "w_map": u(ks[1], (H, H), bH),             # encoder_map, stored [in, out]
        "b_map": u(ks[2], (1, H), bH),
        "wie": u(ks[3], (3, E, H), bH),            # GRU input weights (emb part), gates r,z,n
        "wic": u(ks[4], (3, H, H), bH),            # GRU input weights (context part)
        "whh": u(ks[5], (3, H, H), bH),            # GRU hidden weights
        "bih": u(ks[6], (3, 1, H), bH),
        "bhh": u(ks[7], (3, 1, H), bH),
        "wcls_c": u(ks[8], (H, V), b2H),           # classifier on context half
        "wcls_h": u(ks[9], (H, V), b2H),           # classifier on hidden half
        "b_cls": u(ks[10], (1, V), b2H),
    }


def reference_forward(params, encoder_states, encoder_output, target_sequence,
                      matmul_dtype=jnp.float32):
    """Pure-JAX replica of the PyTorch forward (dropout as identity)."""
    def mm(a, b):
        return jnp.dot(a.astype(matmul_dtype), b.astype(matmul_dtype),
                       preferred_element_type=jnp.float32)

    B, S, H = encoder_states.shape
    T = target_sequence.shape[1]
    h = mm(encoder_output, params["w_map"]) + params["b_map"]
    ctx = jnp.zeros((B, H), jnp.float32)
    outs = []
    for t in range(T):
        x = params["emb"][target_sequence[:, t]]
        gi = lambda g: mm(x, params["wie"][g]) + mm(ctx, params["wic"][g]) + params["bih"][g]
        gh = lambda g: mm(h, params["whh"][g]) + params["bhh"][g]
        r = jax.nn.sigmoid(gi(0) + gh(0))
        z = jax.nn.sigmoid(gi(1) + gh(1))
        n = jnp.tanh(gi(2) + r * gh(2))
        h = (1.0 - z) * n + z * h
        scores = jnp.einsum("bsh,bh->bs", encoder_states.astype(matmul_dtype),
                            h.astype(matmul_dtype), preferred_element_type=jnp.float32)
        p = jax.nn.softmax(scores, axis=-1)
        ctx = jnp.einsum("bsh,bs->bh", encoder_states.astype(matmul_dtype),
                         p.astype(matmul_dtype), preferred_element_type=jnp.float32)
        outs.append(mm(ctx, params["wcls_c"]) + mm(h, params["wcls_h"]) + params["b_cls"])
    return jnp.stack(outs, axis=1)


if __name__ == "__main__":
    key = jax.random.PRNGKey(0)
    num_embeddings, embedding_size, rnn_hidden_size = 64, 32, 32
    B, S_enc, T = 2, 8, 8

    pkey, ekey, okey, tkey = jax.random.split(key, 4)
    params = init_params(pkey, num_embeddings, embedding_size, rnn_hidden_size)
    encoder_states = jax.random.normal(ekey, (B, S_enc, rnn_hidden_size), jnp.float32)
    encoder_output = jax.random.normal(okey, (B, rnn_hidden_size), jnp.float32)
    target_sequence = jax.random.randint(tkey, (B, T), 0, num_embeddings).astype(jnp.int32)

    out = nmt_decoder_forward(params, encoder_states, encoder_output, target_sequence,
                              matmul_dtype=jnp.bfloat16)
    out = jax.block_until_ready(out)

    ref = reference_forward(params, encoder_states, encoder_output, target_sequence,
                            matmul_dtype=jnp.bfloat16)
    assert out.shape == (B, T, num_embeddings), out.shape
    err = float(jnp.max(jnp.abs(out - ref)))
    assert err < 2e-2, f"max |kernel - reference| = {err}"
    print("KERNEL_OK")
</pallas_src>

<mosaic_0001>
module attributes {stable_mosaic.version = 11 : i64} {
  func.func @_nmt_recurrence_kernel(%arg0: i32, %arg1: memref<8x8x128xbf16, #tpu.memory_space<vmem>>, %arg2: memref<8x8x128xbf16, #tpu.memory_space<vmem>>, %arg3: memref<8x128xbf16, #tpu.memory_space<vmem>>, %arg4: memref<128x128xbf16, #tpu.memory_space<vmem>>, %arg5: memref<1x128xf32, #tpu.memory_space<vmem>>, %arg6: memref<256x384xbf16, #tpu.memory_space<vmem>>, %arg7: memref<1x384xf32, #tpu.memory_space<vmem>>, %arg8: memref<128x384xbf16, #tpu.memory_space<vmem>>, %arg9: memref<1x384xf32, #tpu.memory_space<vmem>>, %arg10: memref<1x8x256xbf16, #tpu.memory_space<vmem>>, %arg11: memref<8x128xf32, #tpu.memory_space<vmem>>, %arg12: memref<8x128xf32, #tpu.memory_space<vmem>>) attributes {dimension_semantics = [#tpu.dimension_semantics<arbitrary>], iteration_bounds = array<i64: 8>, scalar_prefetch = 0 : i64, scratch_operands = 2 : i64, tpu.core_type = #tpu.core_type<tc>, window_params = [{pipeline_mode = #tpu.pipeline_mode<synchronous>, transform_indices = @transform_0, window_bounds = array<i64: 8, 8, 128>}, {pipeline_mode = #tpu.pipeline_mode<synchronous>, transform_indices = @transform_1, window_bounds = array<i64: 8, 8, 128>}, {pipeline_mode = #tpu.pipeline_mode<synchronous>, transform_indices = @transform_2, window_bounds = array<i64: 8, 128>}, {pipeline_mode = #tpu.pipeline_mode<synchronous>, transform_indices = @transform_3, window_bounds = array<i64: 128, 128>}, {pipeline_mode = #tpu.pipeline_mode<synchronous>, transform_indices = @transform_4, window_bounds = array<i64: 1, 128>}, {pipeline_mode = #tpu.pipeline_mode<synchronous>, transform_indices = @transform_5, window_bounds = array<i64: 256, 384>}, {pipeline_mode = #tpu.pipeline_mode<synchronous>, transform_indices = @transform_6, window_bounds = array<i64: 1, 384>}, {pipeline_mode = #tpu.pipeline_mode<synchronous>, transform_indices = @transform_7, window_bounds = array<i64: 128, 384>}, {pipeline_mode = #tpu.pipeline_mode<synchronous>, transform_indices = @transform_8, window_bounds = array<i64: 1, 384>}, {transform_indices = @transform_9, window_bounds = array<i64: 1, 8, 256>}]} {
    %c0_i32 = arith.constant 0 : i32
    %0 = arith.cmpi eq, %arg0, %c0_i32 : i32
    %1 = arith.extui %0 : i1 to i32
    %c0_i32_0 = arith.constant 0 : i32
    %2 = arith.cmpi ne, %1, %c0_i32_0 : i32
    scf.if %2 {
      %c0_32 = arith.constant 0 : index
      %c0_33 = arith.constant 0 : index
      %76 = vector.load %arg3[%c0_32, %c0_33] : memref<8x128xbf16, #tpu.memory_space<vmem>>, vector<8x128xbf16>
      %c0_34 = arith.constant 0 : index
      %c0_35 = arith.constant 0 : index
      %77 = vector.load %arg4[%c0_34, %c0_35] : memref<128x128xbf16, #tpu.memory_space<vmem>>, vector<128x128xbf16>
      %cst_36 = arith.constant dense<0.000000e+00> : vector<8x128xf32>
      %78 = tpu.matmul %76, %77, %cst_36 {dimension_numbers = #tpu.dot_dimension_numbers<[1], [0], [0], [1], [0, 0, 1, 1], [], []>} : vector<8x128xbf16>, vector<128x128xbf16>, vector<8x128xf32> -> vector<8x128xf32>
      %c0_37 = arith.constant 0 : index
      %c0_38 = arith.constant 0 : index
      %79 = vector.load %arg5[%c0_37, %c0_38] : memref<1x128xf32, #tpu.memory_space<vmem>>, vector<1x128xf32>
      %80 = vector.broadcast %79 : vector<1x128xf32> to vector<8x128xf32>
      %81 = arith.addf %78, %80 : vector<8x128xf32>
      %c0_39 = arith.constant 0 : index
      %c0_40 = arith.constant 0 : index
      %82 = vector.load %arg11[%c0_39, %c0_40] : memref<8x128xf32, #tpu.memory_space<vmem>>, vector<8x128xf32>
      tpu.vector_store %arg11[%c0_39, %c0_40], %81 {strides = array<i32>} : memref<8x128xf32, #tpu.memory_space<vmem>>, vector<8x128xf32>,
      %cst_41 = arith.constant 0.000000e+00 : f32
      %83 = vector.broadcast %cst_41 : f32 to vector<8x128xf32>
      %c0_42 = arith.constant 0 : index
      %c0_43 = arith.constant 0 : index
      %84 = vector.load %arg12[%c0_42, %c0_43] : memref<8x128xf32, #tpu.memory_space<vmem>>, vector<8x128xf32>
      tpu.vector_store %arg12[%c0_42, %c0_43], %83 {strides = array<i32>} : memref<8x128xf32, #tpu.memory_space<vmem>>, vector<8x128xf32>,
    } else {
    }
    %3 = arith.index_cast %arg0 : i32 to index
    %c0 = arith.constant 0 : index
    %c0_1 = arith.constant 0 : index
    %4 = vector.load %arg1[%3, %c0, %c0_1] : memref<8x8x128xbf16, #tpu.memory_space<vmem>>, vector<1x8x128xbf16>
    %5 = vector.shape_cast %4 : vector<1x8x128xbf16> to vector<8x128xbf16>
    %c0_2 = arith.constant 0 : index
    %c0_3 = arith.constant 0 : index
    %6 = vector.load %arg11[%c0_2, %c0_3] : memref<8x128xf32, #tpu.memory_space<vmem>>, vector<8x128xf32>
    %c0_4 = arith.constant 0 : index
    %c0_5 = arith.constant 0 : index
    %7 = vector.load %arg12[%c0_4, %c0_5] : memref<8x128xf32, #tpu.memory_space<vmem>>, vector<8x128xf32>
    %8 = arith.truncf %7 : vector<8x128xf32> to vector<8x128xbf16>
    %9 = tpu.concatenate %5, %8 in 1 : vector<8x128xbf16>, vector<8x128xbf16> -> vector<8x256xbf16>
    %c0_6 = arith.constant 0 : index
    %c0_7 = arith.constant 0 : index
    %10 = vector.load %arg6[%c0_6, %c0_7] : memref<256x384xbf16, #tpu.memory_space<vmem>>, vector<256x384xbf16>
    %cst = arith.constant dense<0.000000e+00> : vector<8x384xf32>
    %11 = tpu.matmul %9, %10, %cst {dimension_numbers = #tpu.dot_dimension_numbers<[1], [0], [0], [1], [0, 0, 1, 1], [], []>} : vector<8x256xbf16>, vector<256x384xbf16>, vector<8x384xf32> -> vector<8x384xf32>
    %c0_8 = arith.constant 0 : index
    %c0_9 = arith.constant 0 : index
    %12 = vector.load %arg7[%c0_8, %c0_9] : memref<1x384xf32, #tpu.memory_space<vmem>>, vector<1x384xf32>
    %13 = vector.broadcast %12 : vector<1x384xf32> to vector<8x384xf32>
    %14 = arith.addf %11, %13 : vector<8x384xf32>
    %15 = arith.truncf %6 : vector<8x128xf32> to vector<8x128xbf16>
    %c0_10 = arith.constant 0 : index
    %c0_11 = arith.constant 0 : index
    %16 = vector.load %arg8[%c0_10, %c0_11] : memref<128x384xbf16, #tpu.memory_space<vmem>>, vector<128x384xbf16>
    %cst_12 = arith.constant dense<0.000000e+00> : vector<8x384xf32>
    %17 = tpu.matmul %15, %16, %cst_12 {dimension_numbers = #tpu.dot_dimension_numbers<[1], [0], [0], [1], [0, 0, 1, 1], [], []>} : vector<8x128xbf16>, vector<128x384xbf16>, vector<8x384xf32> -> vector<8x384xf32>
    %c0_13 = arith.constant 0 : index
    %c0_14 = arith.constant 0 : index
    %18 = vector.load %arg9[%c0_13, %c0_14] : memref<1x384xf32, #tpu.memory_space<vmem>>, vector<1x384xf32>
    %19 = vector.broadcast %18 : vector<1x384xf32> to vector<8x384xf32>
    %20 = arith.addf %17, %19 : vector<8x384xf32>
    %21 = vector.extract_strided_slice %14 {offsets = [0, 0], sizes = [8, 128], strides = [1, 1]} : vector<8x384xf32> to vector<8x128xf32>
    %22 = vector.extract_strided_slice %20 {offsets = [0, 0], sizes = [8, 128], strides = [1, 1]} : vector<8x384xf32> to vector<8x128xf32>
    %23 = arith.addf %21, %22 : vector<8x128xf32>
    %24 = arith.negf %23 : vector<8x128xf32>
    %25 = math.exp %24 : vector<8x128xf32>
    %cst_15 = arith.constant 1.000000e+00 : f32
    %26 = vector.broadcast %cst_15 : f32 to vector<8x128xf32>
    %27 = arith.addf %26, %25 : vector<8x128xf32>
    %28 = arith.divf %26, %27 : vector<8x128xf32>
    %29 = vector.extract_strided_slice %14 {offsets = [0, 128], sizes = [8, 128], strides = [1, 1]} : vector<8x384xf32> to vector<8x128xf32>
    %30 = vector.extract_strided_slice %20 {offsets = [0, 128], sizes = [8, 128], strides = [1, 1]} : vector<8x384xf32> to vector<8x128xf32>
    %31 = arith.addf %29, %30 : vector<8x128xf32>
    %32 = arith.negf %31 : vector<8x128xf32>
    %33 = math.exp %32 : vector<8x128xf32>
    %cst_16 = arith.constant 1.000000e+00 : f32
    %34 = vector.broadcast %cst_16 : f32 to vector<8x128xf32>
    %35 = arith.addf %34, %33 : vector<8x128xf32>
    %36 = arith.divf %34, %35 : vector<8x128xf32>
    %37 = vector.extract_strided_slice %14 {offsets = [0, 256], sizes = [8, 128], strides = [1, 1]} : vector<8x384xf32> to vector<8x128xf32>
    %38 = vector.extract_strided_slice %20 {offsets = [0, 256], sizes = [8, 128], strides = [1, 1]} : vector<8x384xf32> to vector<8x128xf32>
    %39 = arith.mulf %28, %38 : vector<8x128xf32>
    %40 = arith.addf %37, %39 : vector<8x128xf32>
    %41 = math.tanh %40 : vector<8x128xf32>
    %cst_17 = arith.constant 1.000000e+00 : f32
    %42 = vector.broadcast %cst_17 : f32 to vector<8x128xf32>
    %43 = arith.subf %42, %36 : vector<8x128xf32>
    %44 = arith.mulf %43, %41 : vector<8x128xf32>
    %45 = arith.mulf %36, %6 : vector<8x128xf32>
    %46 = arith.addf %44, %45 : vector<8x128xf32>
    %c0_18 = arith.constant 0 : index
    %c0_19 = arith.constant 0 : index
    %c0_20 = arith.constant 0 : index
    %47 = vector.load %arg2[%c0_18, %c0_19, %c0_20] : memref<8x8x128xbf16, #tpu.memory_space<vmem>>, vector<8x8x128xbf16>
    %48 = arith.extf %47 : vector<8x8x128xbf16> to vector<8x8x128xf32>
    %49 = arith.truncf %46 : vector<8x128xf32> to vector<8x128xbf16>
    %50 = arith.extf %49 : vector<8x128xbf16> to vector<8x128xf32>
    %51 = vector.shape_cast %50 : vector<8x128xf32> to vector<8x1x128xf32>
    %52 = vector.broadcast %51 : vector<8x1x128xf32> to vector<8x8x128xf32>
    %53 = arith.mulf %48, %52 : vector<8x8x128xf32>
    %cst_21 = arith.constant dense<0.000000e+00> : vector<8x8xf32>
    %54 = vector.multi_reduction <add>, %53, %cst_21 [2] : vector<8x8x128xf32> to vector<8x8xf32>
    %55 = vector.shape_cast %54 : vector<8x8xf32> to vector<8x8x1xf32>
    %cst_22 = arith.constant dense<0xFF800000> : vector<8x1xf32>
    %56 = vector.multi_reduction <maximumf>, %55, %cst_22 [1] : vector<8x8x1xf32> to vector<8x1xf32>
    %57 = vector.shape_cast %56 : vector<8x1xf32> to vector<8x1x1xf32>
    %58 = vector.broadcast %57 : vector<8x1x1xf32> to vector<8x8x1xf32>
    %59 = arith.subf %55, %58 : vector<8x8x1xf32>
    %60 = math.exp %59 : vector<8x8x1xf32>
    %cst_23 = arith.constant dense<0.000000e+00> : vector<8x1xf32>
    %61 = vector.multi_reduction <add>, %60, %cst_23 [1] : vector<8x8x1xf32> to vector<8x1xf32>
    %62 = vector.shape_cast %61 : vector<8x1xf32> to vector<8x1x1xf32>
    %63 = tpu.reciprocal %62 {approx = true} : vector<8x1x1xf32> -> vector<8x1x1xf32>
    %64 = vector.broadcast %63 : vector<8x1x1xf32> to vector<8x8x1xf32>
    %65 = arith.mulf %60, %64 : vector<8x8x1xf32>
    %66 = vector.broadcast %65 : vector<8x8x1xf32> to vector<8x8x128xf32>
    %67 = arith.mulf %66, %48 : vector<8x8x128xf32>
    %cst_24 = arith.constant dense<0.000000e+00> : vector<8x128xf32>
    %68 = vector.multi_reduction <add>, %67, %cst_24 [1] : vector<8x8x128xf32> to vector<8x128xf32>
    %c0_25 = arith.constant 0 : index
    %c0_26 = arith.constant 0 : index
    %69 = vector.load %arg11[%c0_25, %c0_26] : memref<8x128xf32, #tpu.memory_space<vmem>>, vector<8x128xf32>
    tpu.vector_store %arg11[%c0_25, %c0_26], %46 {strides = array<i32>} : memref<8x128xf32, #tpu.memory_space<vmem>>, vector<8x128xf32>,
    %c0_27 = arith.constant 0 : index
    %c0_28 = arith.constant 0 : index
    %70 = vector.load %arg12[%c0_27, %c0_28] : memref<8x128xf32, #tpu.memory_space<vmem>>, vector<8x128xf32>
    tpu.vector_store %arg12[%c0_27, %c0_28], %68 {strides = array<i32>} : memref<8x128xf32, #tpu.memory_space<vmem>>, vector<8x128xf32>,
    %71 = tpu.concatenate %68, %46 in 1 : vector<8x128xf32>, vector<8x128xf32> -> vector<8x256xf32>
    %72 = arith.truncf %71 : vector<8x256xf32> to vector<8x256xbf16>
    %c0_29 = arith.constant 0 : index
    %c0_30 = arith.constant 0 : index
    %c0_31 = arith.constant 0 : index
    %73 = vector.load %arg10[%c0_29, %c0_30, %c0_31] : memref<1x8x256xbf16, #tpu.memory_space<vmem>>, vector<1x8x256xbf16>
    %74 = vector.shape_cast %73 : vector<1x8x256xbf16> to vector<8x256xbf16>
    %75 = vector.shape_cast %72 : vector<8x256xbf16> to vector<1x8x256xbf16>
    tpu.vector_store %arg10[%c0_29, %c0_30, %c0_31], %75 {strides = array<i32>} : memref<1x8x256xbf16, #tpu.memory_space<vmem>>, vector<1x8x256xbf16>,
    return
  }
  func.func @transform_0(%arg0: i32) -> (i32, i32, i32) {
    %c0_i32 = arith.constant 0 : i32
    %c0_i32_0 = arith.constant 0 : i32
    %c0_i32_1 = arith.constant 0 : i32
    %c0_i32_2 = arith.constant 0 : i32
    return %c0_i32, %c0_i32_0, %c0_i32_1 : i32, i32, i32
  }
  func.func @transform_1(%arg0: i32) -> (i32, i32, i32) {
    %c0_i32 = arith.constant 0 : i32
    %c0_i32_0 = arith.constant 0 : i32
    %c0_i32_1 = arith.constant 0 : i32
    %c0_i32_2 = arith.constant 0 : i32
    return %c0_i32, %c0_i32_0, %c0_i32_1 : i32, i32, i32
  }
  func.func @transform_2(%arg0: i32) -> (i32, i32) {
    %c0_i32 = arith.constant 0 : i32
    %c0_i32_0 = arith.constant 0 : i32
    %c0_i32_1 = arith.constant 0 : i32
    return %c0_i32, %c0_i32_0 : i32, i32
  }
  func.func @transform_3(%arg0: i32) -> (i32, i32) {
    %c0_i32 = arith.constant 0 : i32
    %c0_i32_0 = arith.constant 0 : i32
    %c0_i32_1 = arith.constant 0 : i32
    return %c0_i32, %c0_i32_0 : i32, i32
  }
  func.func @transform_4(%arg0: i32) -> (i32, i32) {
    %c0_i32 = arith.constant 0 : i32
    %c0_i32_0 = arith.constant 0 : i32
    %c0_i32_1 = arith.constant 0 : i32
    return %c0_i32, %c0_i32_0 : i32, i32
  }
  func.func @transform_5(%arg0: i32) -> (i32, i32) {
    %c0_i32 = arith.constant 0 : i32
    %c0_i32_0 = arith.constant 0 : i32
    %c0_i32_1 = arith.constant 0 : i32
    return %c0_i32, %c0_i32_0 : i32, i32
  }
  func.func @transform_6(%arg0: i32) -> (i32, i32) {
    %c0_i32 = arith.constant 0 : i32
    %c0_i32_0 = arith.constant 0 : i32
    %c0_i32_1 = arith.constant 0 : i32
    return %c0_i32, %c0_i32_0 : i32, i32
  }
  func.func @transform_7(%arg0: i32) -> (i32, i32) {
    %c0_i32 = arith.constant 0 : i32
    %c0_i32_0 = arith.constant 0 : i32
    %c0_i32_1 = arith.constant 0 : i32
    return %c0_i32, %c0_i32_0 : i32, i32
  }
  func.func @transform_8(%arg0: i32) -> (i32, i32) {
    %c0_i32 = arith.constant 0 : i32
    %c0_i32_0 = arith.constant 0 : i32
    %c0_i32_1 = arith.constant 0 : i32
    return %c0_i32, %c0_i32_0 : i32, i32
  }
  func.func @transform_9(%arg0: i32) -> (i32, i32, i32) {
    %c0_i32 = arith.constant 0 : i32
    %c0_i32_0 = arith.constant 0 : i32
    %c0_i32_1 = arith.constant 0 : i32
    return %arg0, %c0_i32, %c0_i32_0 : i32, i32, i32
  }
}

</mosaic_0001>

<bundles_post_ra>
// kernel: tpu_custom_call.1
= control target key start
LH: loop header
LB: loop body
LE: loop exit
PB: predicated region body
PF: predicated region fallthrough
CT: control target
= control target key end

     0   :  { %s2805_s0 = inlined_call_operand.hbm [shape: bf16[8,8,128], index: 0, kind: input, shape index: {}]   ;;  %s2806_s1 = inlined_call_operand.hbm [shape: bf16[8,8,128], index: 1, kind: input, shape index: {}]   ;;  %s2807_s2 = inlined_call_operand.vmem [shape: bf16[8,128], index: 2, kind: input, shape index: {}]   ;;  %s2808_s3 = inlined_call_operand.hbm [shape: bf16[128,128], index: 3, kind: input, shape index: {}]   ;;  %s2809_s4 = inlined_call_operand.vmem [shape: f32[1,128], index: 4, kind: input, shape index: {}]   ;;  %s2810_s5 = inlined_call_operand.hbm [shape: bf16[256,384], index: 5, kind: input, shape index: {}]   ;;  %s2811_s6 = inlined_call_operand.vmem [shape: f32[1,384], index: 6, kind: input, shape index: {}]   ;;  %s2812_s7 = inlined_call_operand.hbm [shape: bf16[128,384], index: 7, kind: input, shape index: {}]   ;;  %s2813_s8 = inlined_call_operand.vmem [shape: f32[1,384], index: 8, kind: input, shape index: {}]   ;;  %s2814_s9 = inlined_call_operand.hbm [shape: bf16[8,8,256], index: 9, kind: output, shape index: {}]  }
   0x1   :  { %2828 = sst [smem:[#allocation22_spill]] %s2806_s1 }
   0x2   :  { %14 = vsyncpa [#allocation5], 0 }
   0x3   :  { %15 = vsyncpa [#allocation8], 0 }
   0x4   :  { %16 = vsyncpa [#allocation11], 0 }
   0x5   :  { %17 = vsyncpa [#allocation6], 0 }
   0x6   :  { %19 = vsyncpa [#allocation6 + $0x1], 0  ;;  %s2420_s30 = smov 0   ;;  %s2422_s10 = smov 0  }
   0x7   :  { %s2424_s11 = smov 0   ;;  %s2426_s12 = smov 0  }
   0x8 LB: > { %2829 = sst [smem:[#allocation18_spill]] %s2348_s11  ;;  %s2441_s13 = sadd.s32 4294967295, %s2352_s12   ;;  %s2352_s12 = sphi %s2426_s12, %s2854_s12   ;;  %s2348_s11 = sphi %s2424_s11, %s2856_s11   ;;  %s2344_s10 = sphi %s2422_s10, %s2858_s10   ;;  %s2340_s30 = sphi %s2420_s30, %s2857_s30  }
   0x9   : > { %s1678_s14 = sadd.s32 4294967294, %s2352_s12   ;;  %s2445_s15 = sadd.s32 1, %s2352_s12  }
   0xa   : > { %2830 = sst [smem:[#allocation19_spill]] %s2445_s15  ;;  %s221_s16 = sadd.s32 1, %s2348_s11 }
   0xb   : > { %s218_s17 = ssub.s32 %s2352_s12, %s2445_s15  ;;  %p231_p0 = scmp.ne.s32.totalorder %s2348_s11, %s2344_s10 }
   0xc   : > { %p219_p1 = scmp.eq.s32.totalorder %s218_s17, 0  ;;  %p232_p2 = scmp.eq.s32.totalorder %s2441_s13, 7 }
   0xd   : > { %p237_p3 = scmp.ne.s32.totalorder %s2344_s10, %s2340_s30  ;;  %p238_p4 = scmp.eq.s32.totalorder %s1678_s14, 7 }
   0xe   : > { %s2456_s18 = scalar_select %p219_p1, %s2348_s11, %s221_s16  }
   0xf   : > { %p2458_p5 = por %p232_p2, %p231_p0  ;;  %p2462_p6 = por %p238_p4, %p237_p3 }
  0x10   : > { %2831 = sst [smem:[#allocation20_spill]] %s2456_s18  ;;  %p1679_p7 = scmp.ge.s32.totalorder %s2352_s12, 1 }
  0x11   : > { %s2832_s19 = scalar_select %p2458_p5, 1, 0 }
  0x12   : > { %s2833_s20 = scalar_select %p2462_p6, 1, 0 }
  0x13   : > { %p245_p8 = scmp.lt.s32.totalorder %s2352_s12, 9  ;;  %p2815_p10 = scmp.eq.s32.totalorder %s2441_s13, 0 }
  0x14   : > { %2834 = sst [smem:[#allocation21_spill]] %s2833_s20  ;;  %s2354_s22 = smov [#allocation7]  }
  0x15   : > { %p2470_p11 = pnand %p1679_p7, %p245_p8  ;;  %s270_s23 = sshll.u32 %s2354_s22, 4  ;;  %s271_s23 = int_to_ptr.vmem [resolvable:$true] %s270_s23 }
  0x16   : > { %s2355_s25 = smov [#allocation10]   ;;  %s2837_s1 = sld [smem:[#allocation22_spill]] }
  0x17   : > { %s2835_s21 = scalar_select %p2470_p11, 1, 0 }
  0x18   : > { %p1914_p12 = pneg %p2470_p11  ;;  %s302_s26 = sshll.u32 %s2355_s25, 4  ;;  %s2482_s26 = int_to_ptr.vmem [resolvable:$true] %s302_s26 }
  0x1a   : > { %p2478_p13 = pnand %p2815_p10, %p1914_p12 }
  0x1c   : > { %s2138_s29 = scalar_lea.hbm %s2837_s1, 512  ;;  %p2492_p1 = pneg %p2478_p13 }
  0x1d   : > { %p2139_p0 = scmp.ne.s32.totalorder %s2837_s1, %s2138_s29  ;;  %p2145_p4 = scmp.lt.u32.totalorder %s2138_s29, %s2837_s1 }
  0x1f   : > { %p2141_p2 = pnand %p2492_p1, %p2139_p0 }
  0x21   : > { %p2142_p3 = pneg %p2141_p2 }
  0x23   : > { %p2147_p7 = pnand %p2145_p4, %p2142_p3 }
  0x25   : > { %2150 = shalt.err (!%p2147_p7)
}
  0x26   : > { %s2151_s27 = scalar_lea.vmem %s271_s23, 512  ;;  %p2159_p10 = scmp.lt.s32.totalorder %s271_s23, %s271_s23 }
  0x27   : > { %p2152_p8 = scmp.ne.s32.totalorder %s271_s23, %s2151_s27  ;;  %p2160_p6 = scmp.lt.s32.totalorder %s2151_s27, %s2151_s27 }
  0x29   : > { %p2154_p12 = pnand %p2152_p8, %p2492_p1  ;;  %p2161_p5 = por %p2160_p6, %p2159_p10 }
  0x2b   : > { %p2155_p9 = pneg %p2154_p12 }
  0x2d   : > { %p2162_p11 = pnand %p2161_p5, %p2155_p9 }
  0x2f   : > { %2165 = shalt.err (!%p2162_p11)
}
  0x30   : > { %s2822_s28 = smov 64   ;;  %s2824_s14 = smov 4  }
  0x31   : > { %1920 = dma.hbm_to_vmem [thread:$0]  (!%p2478_p13), %s2837_s1, 512, %s271_s23, [#allocation8], %s2822_s28, %s2822_s28, %s2824_s14  }
  0x32   : > { %s2166_s18 = scalar_lea.hbm %s2810_s5, 6144 }
  0x33   : > { %p2167_p5 = scmp.ne.s32.totalorder %s2810_s5, %s2166_s18  ;;  %p2173_p10 = scmp.lt.u32.totalorder %s2166_s18, %s2810_s5 }
  0x35   : > { %p2169_p6 = pnand %p2167_p5, %p2492_p1 }
  0x37   : > { %p2170_p9 = pneg %p2169_p6 }
  0x39   : > { %p2175_p11 = pnand %p2173_p10, %p2170_p9 }
  0x3b   : > { %2178 = shalt.err (!%p2175_p11)
}
  0x3c   : > { %s2179_s23 = scalar_lea.vmem %s2482_s26, 6144  ;;  %p2187_p4 = scmp.lt.s32.totalorder %s2482_s26, %s2482_s26 }
  0x3d   : > { %p2180_p0 = scmp.ne.s32.totalorder %s2482_s26, %s2179_s23  ;;  %p2188_p7 = scmp.lt.s32.totalorder %s2179_s23, %s2179_s23 }
  0x3f   : > { %p2182_p2 = pnand %p2180_p0, %p2492_p1  ;;  %p2189_p8 = por %p2188_p7, %p2187_p4 }
  0x41   : > { %p2183_p3 = pneg %p2182_p2 }
  0x43   : > { %p2190_p12 = pnand %p2189_p8, %p2183_p3 }
  0x45   : > { %2193 = shalt.err (!%p2190_p12)
}
  0x46   : > { %s2826_s11 = smov 192   ;;  %s2827_s15 = smov 12  }
  0x47   : > { %1926 = dma.hbm_to_vmem [thread:$0]  (!%p2478_p13), %s2810_s5, 6144, %s2482_s26, [#allocation11], %s2826_s11, %s2826_s11, %s2827_s15  }
  0x48   : > { %s2360_s29 = smov [#allocation4]   ;;  %s2361_s22 = smov [#allocation9]  }
  0x49   : > { %s257_s16 = sshll.u32 %s2360_s29, 4  ;;  %s286_s25 = sshll.u32 %s2361_s22, 4  ;;  %s258_s16 = int_to_ptr.vmem [resolvable:$true] %s257_s16  ;;  %s2537_s25 = int_to_ptr.vmem [resolvable:$true] %s286_s25 }
  0x4a   : > { %s2194_s28 = scalar_lea.hbm %s2805_s0, 512 }
  0x4b   : > { %p2195_p5 = scmp.ne.s32.totalorder %s2805_s0, %s2194_s28  ;;  %p2201_p10 = scmp.lt.u32.totalorder %s2194_s28, %s2805_s0 }
  0x4d   : > { %p2197_p6 = pnand %p2195_p5, %p2492_p1 }
  0x4f   : > { %p2198_p9 = pneg %p2197_p6 }
  0x51   : > { %p2203_p11 = pnand %p2201_p10, %p2198_p9 }
  0x53   : > { %2206 = shalt.err (!%p2203_p11)
}
  0x54   : > { %s2207_s20 = scalar_lea.vmem %s258_s16, 512  ;;  %p2215_p4 = scmp.lt.s32.totalorder %s258_s16, %s258_s16 }
  0x55   : > { %p2208_p0 = scmp.ne.s32.totalorder %s258_s16, %s2207_s20  ;;  %p2216_p7 = scmp.lt.s32.totalorder %s2207_s20, %s2207_s20 }
  0x57   : > { %p2210_p2 = pnand %p2208_p0, %p2492_p1  ;;  %p2217_p8 = por %p2216_p7, %p2215_p4 }
  0x59   : > { %p2211_p3 = pneg %p2210_p2 }
  0x5b   : > { %p2218_p12 = pnand %p2217_p8, %p2211_p3 }
  0x5d   : > { %2221 = shalt.err (!%p2218_p12)
}
  0x5e   : > { %s2839_s1 = smov 4   ;;  %s2840_s14 = smov 64  }
  0x5f   : > { %1917 = dma.hbm_to_vmem [thread:$0]  (!%p2478_p13), %s2805_s0, 512, %s258_s16, [#allocation5], %s2840_s14, %s2840_s14, %s2839_s1  }
  0x60   : > { %s2222_s23 = scalar_lea.hbm %s2808_s3, 1024 }
  0x61   : > { %p2223_p5 = scmp.ne.s32.totalorder %s2808_s3, %s2222_s23  ;;  %p2229_p10 = scmp.lt.u32.totalorder %s2222_s23, %s2808_s3 }
  0x63   : > { %p2225_p6 = pnand %p2223_p5, %p2492_p1 }
  0x65   : > { %p2226_p9 = pneg %p2225_p6 }
  0x67   : > { %p2231_p11 = pnand %p2229_p10, %p2226_p9 }
  0x69   : > { %2234 = shalt.err (!%p2231_p11)
}
  0x6a   : > { %s2235_s16 = scalar_lea.vmem %s2537_s25, 1024  ;;  %p2243_p4 = scmp.lt.s32.totalorder %s2537_s25, %s2537_s25 }
  0x6b   : > { %p2236_p0 = scmp.ne.s32.totalorder %s2537_s25, %s2235_s16  ;;  %p2244_p7 = scmp.lt.s32.totalorder %s2235_s16, %s2235_s16 }
  0x6d   : > { %p2238_p2 = pnand %p2236_p0, %p2492_p1  ;;  %p2245_p8 = por %p2244_p7, %p2243_p4 }
  0x6f   : > { %p2239_p3 = pneg %p2238_p2 }
  0x71   : > { %p2246_p12 = pnand %p2245_p8, %p2239_p3 }
  0x73   : > { %2249 = shalt.err (!%p2246_p12)
}
  0x74   : > { %1923 = dma.hbm_to_vmem [thread:$0]  (!%p2478_p13), %s2808_s3, 1024, %s2537_s25, [#allocation8], %s2840_s14, %s2840_s14, %s2839_s1  }
  0x75   : > { %s2362_s28 = smov [#allocation12]   ;;  %s2250_s18 = scalar_lea.hbm %s2812_s7, 3072 }
  0x76   : > { %s318_s22 = sshll.u32 %s2362_s28, 4  ;;  %p2251_p5 = scmp.ne.s32.totalorder %s2812_s7, %s2250_s18  ;;  %s319_s22 = int_to_ptr.vmem [resolvable:$true] %s318_s22 }
  0x77   : > { %p2257_p10 = scmp.lt.u32.totalorder %s2250_s18, %s2812_s7 }
  0x78   : > { %p2253_p6 = pnand %p2251_p5, %p2492_p1 }
  0x7a   : > { %p2254_p9 = pneg %p2253_p6 }
  0x7c   : > { %p2259_p11 = pnand %p2257_p10, %p2254_p9 }
  0x7e   : > { %2262 = shalt.err (!%p2259_p11)
}
  0x7f   : > { %s2263_s25 = scalar_lea.vmem %s319_s22, 3072  ;;  %p2271_p4 = scmp.lt.s32.totalorder %s319_s22, %s319_s22 }
  0x80   : > { %p2264_p0 = scmp.ne.s32.totalorder %s319_s22, %s2263_s25  ;;  %p2272_p7 = scmp.lt.s32.totalorder %s2263_s25, %s2263_s25 }
  0x82   : > { %p2266_p2 = pnand %p2264_p0, %p2492_p1  ;;  %p2273_p8 = por %p2272_p7, %p2271_p4 }
  0x84   : > { %p2267_p3 = pneg %p2266_p2 }
  0x86   : > { %p2274_p12 = pnand %p2273_p8, %p2267_p3 }
  0x88   : > { %2277 = shalt.err (!%p2274_p12)
}
  0x89   : > { %s2841_s1 = smov 12   ;;  %s2842_s14 = smov 192  }
  0x8a   : > { %1929 = dma.hbm_to_vmem [thread:$0]  (!%p2478_p13), %s2812_s7, 3072, %s319_s22, [#allocation11], %s2842_s14, %s2842_s14, %s2841_s1  }
  0x8b   : > { %p2843_p5 = scmp.ne.s32.totalorder %s2835_s21, 0 }
  0x8c   : > { %p2844_p1 = scmp.eq.s32.totalorder (!%p2843_p5), %s2441_s13, 0 }
  0x8d   : > { %337 = sbr.rel (%p2843_p5) target bundleno = 1012 (0x3f4), region = 56 }
  0x94   : > { %2323 = dma.done.wait (%p2844_p1), [#allocation5], 512   ;;  %p2845_p6 = pmov %p2844_p1 }
  0x95   : > { %p2846_p9 = pmov %p2844_p1 }
  0x96   : > { %2325 = vsyncadd (%p2845_p6), [#allocation5], 4294966784 }
  0x97   : > { %2327 = dma.done.wait (%p2846_p9), [#allocation8], 1536   ;;  %p2847_p10 = pmov %p2844_p1 }
  0x98   : > { %p2848_p11 = pmov %p2844_p1 }
  0x99   : > { %2329 = vsyncadd (%p2847_p10), [#allocation8], 4294965760 }
  0x9a   : > { %2331 = dma.done.wait (%p2848_p11), [#allocation11], 9216   ;;  %p2849_p13 = pmov %p2844_p1 }
  0x9b   : > { %s381_s21 = sand.u32 1, %s2344_s10   ;;  %p2850_p0 = scmp.ne.s32.totalorder %s2441_s13, 0 }
  0x9c   : > { %2333 = vsyncadd (%p2849_p13), [#allocation11], 4294958080  ;;  %s2624_s24 = sshll.u32 %s381_s21, 3  ;;  %v1992_v0 = vld [vmem:[#allocation9] sm:$0xff] (!%p2850_p0)   ;;  %v2363_v1 = vmov (!%p2850_p0), 0.0   ;;  %v1993_v2 = vld [vmem:[#allocation9 + $0x8] sm:$0xff] (!%p2850_p0)  }
  0x9d   : > { %s383_s17 = scalar_lea.vmem [#allocation13], %s2624_s24  ;;  %388 = sbr.rel (%p2850_p0) target bundleno = 404 (0x194), region = 80  ;;  %1844 = vmatprep.subr.bf16.mxu0 (!%p2850_p0), %v2363_v1  ;;  %502 = vst [vmem:[#allocation3] sm:$0xff] (!%p2850_p0), %v2363_v1  ;;  %vm2364_vm0 = vmmov (!%p2850_p0), 0   ;;  %v1994_v3 = vld [vmem:[#allocation9 + $0x10] sm:$0xff] (!%p2850_p0)   ;;  %v1995_v4 = vld [vmem:[#allocation9 + $0x18] sm:$0xff] (!%p2850_p0)  }
  0x9e   : > { %1845 = vmatpush3.bf16.msra.mxu0 (!%p2850_p0), %v1992_v0  ;;  %1860 = vmatprep.mubr.msk.bf16.mxu0 (!%p2850_p0), %vm2364_vm0, %v2363_v1  ;;  %v1996_v5 = vld [vmem:[#allocation9 + $0x20] sm:$0xff] (!%p2850_p0)   ;;  %v1997_v6 = vld [vmem:[#allocation9 + $0x28] sm:$0xff] (!%p2850_p0)   ;;  %v1998_v7 = vld [vmem:[#allocation9 + $0x30] sm:$0xff] (!%p2850_p0)  }
  0x9f   : > { %1846 = vmatprep.subr.bf16.mxu0 (!%p2850_p0), %v2363_v1  ;;  %v1999_v8 = vld [vmem:[#allocation9 + $0x38] sm:$0xff] (!%p2850_p0)   ;;  %v389_v9 = vld [vmem:[%s2807_s2] sm:$0xf] (!%p2850_p0) }
  0xa0   : > { %v1693_v10 = vld [vmem:[%s2809_s4] ss:$0 sm:$0xff] (!%p2850_p0) }
  0xa2   : > { %1847 = vmatpush3.bf16.msra.mxu0 (!%p2850_p0), %v1993_v2 }
  0xa3   : > { %1848 = vmatprep.subr.bf16.mxu0 (!%p2850_p0), %v2363_v1 }
  0xa6   : > { %1849 = vmatpush3.bf16.msra.mxu0 %v1994_v3 }
  0xa7   : > { %1850 = vmatprep.subr.bf16.mxu0 %v2363_v1 }
  0xaa   : > { %1851 = vmatpush3.bf16.msra.mxu0 %v1995_v4 }
  0xab   : > { %1852 = vmatprep.subr.bf16.mxu0 %v2363_v1 }
  0xae   : > { %1853 = vmatpush3.bf16.msra.mxu0 %v1996_v5 }
  0xaf   : > { %1854 = vmatprep.subr.bf16.mxu0 %v2363_v1 }
  0xb2   : > { %1855 = vmatpush3.bf16.msra.mxu0 %v1997_v6 }
  0xb3   : > { %1856 = vmatprep.subr.bf16.mxu0 %v2363_v1 }
  0xb6   : > { %1857 = vmatpush3.bf16.msra.mxu0 %v1998_v7 }
  0xb7   : > { %1858 = vmatprep.subr.bf16.mxu0 %v2363_v1 }
  0xba   : > { %1859 = vmatpush3.bf16.msra.mxu0 %v1999_v8 }
  0xbd   : > { %1861 = vmatmul.mubr.bf16.vlgmr.msra.gmra.mrb[0].mxu0 %v389_v9 }
 0x190   : > { %v495_v11 = vpop.f32.mrb[0].mxu0 }
 0x191   : > { %v496_v12 = vadd.f32 %v1693_v10, %v495_v11  ;;  %v1862_v13 = vpop.f32.mrb[1].mxu0 }
 0x192   : > { %v498_v14 = vpop.f32.mrb[2].mxu0 }
 0x193   : > { %501 = vst [vmem:[#allocation2] sm:$0xff] %v496_v12  ;;  %v1863_v15 = vpop.f32.mrb[3].mxu0 }
 0x194 PF: > { %v2000_v16 = vld [vmem:[#allocation10 + $0x4] ss:$12 sps:$4 sm:$0xff]   ;;  %v2002_v17 = vld [vmem:[#allocation10] ss:$12 sps:$4 sm:$0xff]   ;;  %v2003_v18 = vld [vmem:[#allocation10 + $0x1c] ss:$12 sps:$4 sm:$0xff]  }
 0x195   : > { %846 = vmatprep.subr.bf16.mxu0 %v2000_v16  ;;  %v2005_v19 = vld [vmem:[#allocation10 + $0x18] ss:$12 sps:$4 sm:$0xff]   ;;  %v2006_v20 = vld [vmem:[#allocation10 + $0x34] ss:$12 sps:$4 sm:$0xff]   ;;  %v2008_v21 = vld [vmem:[#allocation10 + $0x30] ss:$12 sps:$4 sm:$0xff]  }
 0x196   : > { %847 = vmatpush1.bf16.msra.mxu0 %v2002_v17  ;;  %v2009_v22 = vld [vmem:[#allocation10 + $0x4c] ss:$12 sps:$4 sm:$0xff]   ;;  %v2011_v23 = vld [vmem:[#allocation10 + $0x48] ss:$12 sps:$4 sm:$0xff]   ;;  %v2012_v24 = vld [vmem:[#allocation10 + $0x64] ss:$12 sps:$4 sm:$0xff]  }
 0x197   : > { %848 = vmatprep.subr.bf16.mxu0 %v2003_v18  ;;  %v2014_v25 = vld [vmem:[#allocation10 + $0x60] ss:$12 sps:$4 sm:$0xff]   ;;  %v2015_v26 = vld [vmem:[#allocation10 + $0x7c] ss:$12 sps:$4 sm:$0xff]   ;;  %v2017_v27 = vld [vmem:[#allocation10 + $0x78] ss:$12 sps:$4 sm:$0xff]  }
 0x198   : > { %v2042_v28 = vld [vmem:[#allocation10 + $0xc8] ss:$12 sps:$4 sm:$0xff]   ;;  %v2020_v30 = vld [vmem:[#allocation10 + $0x90] ss:$12 sps:$4 sm:$0xff]   ;;  %v2047_v32 = vld [vmem:[#allocation10 + $0xe0] ss:$12 sps:$4 sm:$0xff]  }
 0x199   : > { %v2018_v29 = vld [vmem:[#allocation10 + $0x94] ss:$12 sps:$4 sm:$0xff]   ;;  %1813 = vmatprep.subr.bf16.mxu1 %v2042_v28  ;;  %v2021_v33 = vld [vmem:[#allocation10 + $0xac] ss:$12 sps:$4 sm:$0xff]   ;;  %v2024_v40 = vld [vmem:[#allocation10 + $0xc4] ss:$12 sps:$4 sm:$0xff]  }
 0x19a   : > { %849 = vmatpush1.bf16.msra.mxu0 %v2005_v19  ;;  %v2045_v31 = vld [vmem:[#allocation10 + $0x8] ss:$12 sps:$4 sm:$0xff]   ;;  %v2050_v34 = vld [vmem:[#allocation10 + $0x20] ss:$12 sps:$4 sm:$0xff]   ;;  %v2052_v36 = vld [vmem:[#allocation10 + $0xf8] ss:$12 sps:$4 sm:$0xff]  }
 0x19b   : > { %850 = vmatprep.subr.bf16.mxu0 %v2006_v20  ;;  %1814 = vmatpush3.bf16.msra.mxu1 %v2045_v31  ;;  %v2023_v35 = vld [vmem:[#allocation10 + $0xa8] ss:$12 sps:$4 sm:$0xff]   ;;  %v507_v37 = vld [vmem:[#allocation3] sm:$0xff]  ;;  %v2026_v41 = vld [vmem:[#allocation10 + $0xc0] ss:$12 sps:$4 sm:$0xff]   ;;  %s1702_s23 = sshll.u32 %s2441_s13, 2 }
 0x19c   : > { %1815 = vmatprep.subr.bf16.mxu1 %v2047_v32  ;;  %v508_v38 = vpack.c.bf16 %v507_v37, %v507_v37  ;;  %v2053_v39 = vld [vmem:[#allocation10 + $0x38] ss:$12 sps:$4 sm:$0xff]   ;;  %v2057_v42 = vld [vmem:[#allocation10 + $0x110] ss:$12 sps:$4 sm:$0xff]   ;;  %v2062_v45 = vld [vmem:[#allocation10 + $0x128] ss:$12 sps:$4 sm:$0xff]  }
 0x19d   : > { %v2058_v43 = vld [vmem:[#allocation10 + $0x50] ss:$12 sps:$4 sm:$0xff]   ;;  %v2029_v46 = vld [vmem:[#allocation10 + $0xd8] ss:$12 sps:$4 sm:$0xff]   ;;  %v2030_v47 = vld [vmem:[#allocation10 + $0xf4] ss:$12 sps:$4 sm:$0xff]  }
 0x19e   : > { %851 = vmatpush1.bf16.msra.mxu0 %v2008_v21  ;;  %878 = vmatprep.mubr.bf16.mxu0 %v508_v38  ;;  %v2027_v44 = vld [vmem:[#allocation10 + $0xdc] ss:$12 sps:$4 sm:$0xff]   ;;  %v2067_v49 = vld [vmem:[#allocation10 + $0x140] ss:$12 sps:$4 sm:$0xff]   ;;  %v2072_v53 = vld [vmem:[#allocation10 + $0x158] ss:$12 sps:$4 sm:$0xff]  }
 0x19f   : > { %852 = vmatprep.subr.bf16.mxu0 %v2009_v22  ;;  %1816 = vmatpush3.bf16.msra.mxu1 %v2050_v34  ;;  %v2063_v48 = vld [vmem:[#allocation10 + $0x68] ss:$12 sps:$4 sm:$0xff]   ;;  %v2032_v50 = vld [vmem:[#allocation10 + $0xf0] ss:$12 sps:$4 sm:$0xff]   ;;  %v2033_v51 = vld [vmem:[#allocation10 + $0x10c] ss:$12 sps:$4 sm:$0xff]  }
 0x1a0   : > { %1817 = vmatprep.subr.bf16.mxu1 %v2052_v36  ;;  %919 = vmatprep.mubr.bf16.mxu1 %v508_v38  ;;  %v2068_v52 = vld [vmem:[#allocation10 + $0x80] ss:$12 sps:$4 sm:$0xff]   ;;  %v2035_v54 = vld [vmem:[#allocation10 + $0x108] ss:$12 sps:$4 sm:$0xff]   ;;  %v2036_v55 = vld [vmem:[#allocation10 + $0x124] ss:$12 sps:$4 sm:$0xff]   ;;  %v575_v36 = vlaneseq }
 0x1a1   : > { %v2073_v56 = vld [vmem:[#allocation10 + $0x98] ss:$12 sps:$4 sm:$0xff]   ;;  %v2077_v57 = vld [vmem:[#allocation10 + $0x170] ss:$12 sps:$4 sm:$0xff]   ;;  %v2038_v58 = vld [vmem:[#allocation10 + $0x120] ss:$12 sps:$4 sm:$0xff]  }
 0x1a2   : > { %853 = vmatpush1.bf16.msra.mxu0 %v2011_v23  ;;  %v2078_v59 = vld [vmem:[#allocation10 + $0xb0] ss:$12 sps:$4 sm:$0xff]   ;;  %v2041_v61 = vld [vmem:[#allocation10 + $0x138] ss:$12 sps:$4 sm:$0xff]   ;;  %v2085_v62 = vld [vmem:[#allocation12 + $0x8] ss:$12 sps:$4 sm:$0xff]  }
 0x1a3   : > { %854 = vmatprep.subr.bf16.mxu0 %v2012_v24  ;;  %1818 = vmatpush3.bf16.msra.mxu1 %v2053_v39  ;;  %v2039_v60 = vld [vmem:[#allocation10 + $0x13c] ss:$12 sps:$4 sm:$0xff]   ;;  %v2043_v63 = vld [vmem:[#allocation10 + $0x154] ss:$12 sps:$4 sm:$0xff]   ;;  %v2365_v0 = vmov 0.0   ;;  %s504_s18 = scalar_lea.vmem [#allocation4], %s1702_s23 }
 0x1a4   : > { %1819 = vmatprep.subr.bf16.mxu1 %v2057_v42  ;;  %v505_v1 = vld [vmem:[%s504_s18] sm:$0xf]  ;;  %v2089_v3 = vld [vmem:[#allocation12 + $0x20] ss:$12 sps:$4 sm:$0xff]   ;;  %vm2366_vm1 = vmmov 0   ;;  %v2367_v12 = vmov 0  }
 0x1a5   : > { %v2046_v2 = vld [vmem:[#allocation10 + $0x150] ss:$12 sps:$4 sm:$0xff]   ;;  %v2048_v4 = vld [vmem:[#allocation10 + $0x16c] ss:$12 sps:$4 sm:$0xff]   ;;  %v2051_v5 = vld [vmem:[#allocation10 + $0x168] ss:$12 sps:$4 sm:$0xff]  }
 0x1a6   : > { %855 = vmatpush1.bf16.msra.mxu0 %v2014_v25  ;;  %v2090_v6 = vld [vmem:[#allocation12 + $0x38] ss:$12 sps:$4 sm:$0xff]   ;;  %v2054_v8 = vld [vmem:[#allocation12] ss:$12 sps:$4 sm:$0xff]   ;;  %v2061_v9 = vld [vmem:[#allocation12 + $0x1c] ss:$12 sps:$4 sm:$0xff]  }
 0x1a7   : > { %856 = vmatprep.subr.bf16.mxu0 %v2015_v26  ;;  %1820 = vmatpush3.bf16.msra.mxu1 %v2058_v43  ;;  %v2056_v7 = vld [vmem:[#allocation12 + $0x4] ss:$12 sps:$4 sm:$0xff]   ;;  %v2066_v13 = vld [vmem:[#allocation12 + $0x34] ss:$12 sps:$4 sm:$0xff]   ;;  %v2071_v16 = vld [vmem:[#allocation12 + $0x4c] ss:$12 sps:$4 sm:$0xff]  }
 0x1a8   : > { %1821 = vmatprep.subr.bf16.mxu1 %v2062_v45  ;;  %v2091_v10 = vld [vmem:[#allocation12 + $0x50] ss:$12 sps:$4 sm:$0xff]   ;;  %v2059_v11 = vld [vmem:[#allocation12 + $0x18] ss:$12 sps:$4 sm:$0xff]   ;;  %v2092_v14 = vld [vmem:[#allocation12 + $0x68] ss:$12 sps:$4 sm:$0xff]  }
 0x1a9   : > { %v2064_v15 = vld [vmem:[#allocation12 + $0x30] ss:$12 sps:$4 sm:$0xff]   ;;  %v2093_v17 = vld [vmem:[#allocation12 + $0x80] ss:$12 sps:$4 sm:$0xff]   ;;  %v2069_v18 = vld [vmem:[#allocation12 + $0x48] ss:$12 sps:$4 sm:$0xff]  }
 0x1aa   : > { %857 = vmatpush1.bf16.msra.mxu0 %v2017_v27  ;;  %v2076_v19 = vld [vmem:[#allocation12 + $0x64] ss:$12 sps:$4 sm:$0xff]   ;;  %v2074_v21 = vld [vmem:[#allocation12 + $0x60] ss:$12 sps:$4 sm:$0xff]   ;;  %v2081_v22 = vld [vmem:[#allocation12 + $0x7c] ss:$12 sps:$4 sm:$0xff]  }
 0x1ab   : > { %858 = vmatprep.subr.bf16.mxu0 %v2018_v29  ;;  %1822 = vmatpush3.bf16.msra.mxu1 %v2063_v48  ;;  %v2094_v20 = vld [vmem:[#allocation12 + $0x98] ss:$12 sps:$4 sm:$0xff]   ;;  %v2095_v23 = vld [vmem:[#allocation12 + $0xb0] ss:$12 sps:$4 sm:$0xff]   ;;  %v2084_v26 = vld [vmem:[#allocation12 + $0x94] ss:$12 sps:$4 sm:$0xff]  }
 0x1ac   : > { %1823 = vmatprep.subr.bf16.mxu1 %v2067_v49  ;;  %v2636_v24 = vld [vmem:[#allocation2] sm:$0xff]  ;;  %v2079_v25 = vld [vmem:[#allocation12 + $0x78] ss:$12 sps:$4 sm:$0xff]   ;;  %v576_v37 = vshrl.u32 %v575_v36, 7  ;;  %vm1540_vm2 = vcmask 1041409   ;;  %vm1542_vm3 = vcmask 1042434  }
 0x1ad   : > { %v927_v27 = vpack.c.bf16 %v2636_v24, %v2636_v24  ;;  %v2082_v28 = vld [vmem:[#allocation12 + $0x90] ss:$12 sps:$4 sm:$0xff]   ;;  %v2088_v29 = vld [vmem:[#allocation12 + $0xac] ss:$12 sps:$4 sm:$0xff]   ;;  %vm1544_vm4 = vcmask 1043459   ;;  %vm1546_vm5 = vcmask 1044484  }
 0x1ae   : > { %859 = vmatpush1.bf16.msra.mxu0 %v2020_v30  ;;  %v2086_v30 = vld [vmem:[#allocation12 + $0xa8] ss:$12 sps:$4 sm:$0xff]   ;;  %v2640_v38 = vsub.s32 0, %v576_v37  ;;  %vm1548_vm6 = vcmask 1045509   ;;  %vm1550_vm7 = vcmask 1046534   ;;  %vm1552_vm8 = vcmask 1047559  }
 0x1af   : > { %860 = vmatprep.subr.bf16.mxu0 %v2021_v33  ;;  %1824 = vmatpush3.bf16.msra.mxu1 %v2068_v52  ;;  %s1784_s1 = sshll.u32 %s2441_s13, 7  ;;  %s1579_s14 = sshll.u32 %s383_s17, 4  ;;  %s2761_s14 = int_to_ptr.vmem [resolvable:$true] %s1579_s14 }
 0x1b0   : > { %1825 = vmatprep.subr.bf16.mxu1 %v2072_v53  ;;  %s2759_s29 = scalar_lea.hbm %s2814_s9, %s1784_s1  ;;  %s1565_s13 = scalar_lea.sflag [#allocation6], %s381_s21 }
 0x1b1   : > { %s2278_s28 = scalar_lea.vmem %s2761_s14, 128  ;;  %p2851_p3 = scmp.ne.s32.totalorder %s2832_s19, 0 }
 0x1b2   : > { %861 = vmatpush1.bf16.msra.mxu0 %v2023_v35  ;;  %p2279_p2 = scmp.ne.s32.totalorder %s2761_s14, %s2278_s28  ;;  %s2369_s22 = smov [#allocation13]  }
 0x1b3   : > { %862 = vmatprep.subr.bf16.mxu0 %v2024_v40  ;;  %1826 = vmatpush3.bf16.msra.mxu1 %v2073_v56  ;;  %v573_v40 = vld [vmem:[%s2811_s6] sm:$0x7]  ;;  %s2282_s27 = sshll.u32 %s2369_s22, 4  ;;  %s2283_s27 = int_to_ptr.vmem [resolvable:$false] %s2282_s27 }
 0x1b4   : > { %1827 = vmatprep.subr.bf16.mxu1 %v2077_v57  ;;  %p2280_p4 = pnand %p2279_p2, %p2851_p3  ;;  %s2284_s23 = scalar_lea.vmem %s2283_s27, 256 }
 0x1b5   : > { %p2285_p8 = scmp.lt.s32.totalorder %s2761_s14, %s2283_s27  ;;  %p2286_p12 = scmp.lt.s32.totalorder %s2284_s23, %s2278_s28 }
 0x1b6   : > { %863 = vmatpush1.bf16.msra.mxu0 %v2026_v41  ;;  %v960_v41 = vld [vmem:[%s2813_s8] sm:$0x7]  ;;  %p2281_p7 = pneg %p2280_p4 }
 0x1b7   : > { %864 = vmatprep.subr.bf16.mxu0 %v2027_v44  ;;  %1828 = vmatpush3.bf16.msra.mxu1 %v2078_v59  ;;  %v581_v44 = vsub.s32 1, %v576_v37  ;;  %p2287_p5 = por %p2286_p12, %p2285_p8 }
 0x1b8   : > { %1864 = vmatprep.subr.bf16.mxu1 %v2365_v0 }
 0x1b9   : > { %v582_v48 = vrot.slane %v573_v40, %v581_v44  ;;  %v969_v49 = vrot.slane %v960_v41, %v581_v44  ;;  %p2288_p1 = pnand %p2287_p5, %p2281_p7 }
 0x1ba   : > { %865 = vmatpush1.bf16.msra.mxu0 %v2029_v46  ;;  %920 = vmatmul.mubr.bf16.vlgmr.msra.gmra.mrb[0].mxu1 %v505_v1  ;;  %v578_v46 = vrot.slane %v573_v40, %v2640_v38 }
 0x1bb   : > { %866 = vmatprep.subr.bf16.mxu0 %v2030_v47  ;;  %1865 = vmatpush3.bf16.msra.mxu1 %v2085_v62  ;;  %v965_v47 = vrot.slane %v960_v41, %v2640_v38  ;;  %v1886_v52 = vadd.f32 %v969_v49, %v582_v48  ;;  %v585_v62 = vsub.s32 2, %v576_v37  ;;  %v2678_v49 = vld [vmem:[#allocation7 + $0x18] sm:$0xff]  }
 0x1bc   : > { %1866 = vmatprep.subr.bf16.mxu1 %v2365_v0  ;;  %1880 = vmatprep.mubr.msk.bf16.mxu1 %vm2366_vm1, %v2365_v0 }
 0x1be   : > { %867 = vmatpush1.bf16.msra.mxu0 %v2032_v50  ;;  %v1884_v50 = vadd.f32 %v965_v47, %v578_v46 }
 0x1bf   : > { %868 = vmatprep.subr.bf16.mxu0 %v2033_v51  ;;  %1867 = vmatpush3.bf16.msra.mxu1 %v2089_v3 }
 0x1c0   : > { %1868 = vmatprep.subr.bf16.mxu1 %v2365_v0 }
 0x1c2   : > { %869 = vmatpush1.bf16.msra.mxu0 %v2035_v54 }
 0x1c3   : > { %870 = vmatprep.subr.bf16.mxu0 %v2036_v55  ;;  %1869 = vmatpush3.bf16.msra.mxu1 %v2090_v6 }
 0x1c4   : > { %1870 = vmatprep.subr.bf16.mxu1 %v2365_v0 }
 0x1c6   : > { %871 = vmatpush1.bf16.msra.mxu0 %v2038_v58 }
 0x1c7   : > { %872 = vmatprep.subr.bf16.mxu0 %v2039_v60  ;;  %1871 = vmatpush3.bf16.msra.mxu1 %v2091_v10 }
 0x1c8   : > { %1872 = vmatprep.subr.bf16.mxu1 %v2365_v0 }
 0x1ca   : > { %873 = vmatpush1.bf16.msra.mxu0 %v2041_v61 }
 0x1cb   : > { %874 = vmatprep.subr.bf16.mxu0 %v2043_v63  ;;  %1873 = vmatpush3.bf16.msra.mxu1 %v2092_v14  ;;  %v973_v63 = vrot.slane %v960_v41, %v585_v62 }
 0x1cc   : > { %1874 = vmatprep.subr.bf16.mxu1 %v2365_v0 }
 0x1ce   : > { %875 = vmatpush1.bf16.msra.mxu0 %v2046_v2 }
 0x1cf   : > { %876 = vmatprep.subr.bf16.mxu0 %v2048_v4  ;;  %1875 = vmatpush3.bf16.msra.mxu1 %v2093_v17 }
 0x1d0   : > { %1876 = vmatprep.subr.bf16.mxu1 %v2365_v0 }
 0x1d2   : > { %877 = vmatpush1.bf16.msra.mxu0 %v2051_v5 }
 0x1d3   : > { %1105 = vmatprep.subr.bf16.mxu0 %v2056_v7  ;;  %1877 = vmatpush3.bf16.msra.mxu1 %v2094_v20  ;;  %v2656_v20 = vld [vmem:[#allocation7] sm:$0xff]  }
 0x1d4   : > { %1878 = vmatprep.subr.bf16.mxu1 %v2365_v0 }
 0x1d5   : > { %879 = vmatmul.mubr.bf16.vlgmr.msra.gmra.mrb[0].mxu0 %v505_v1  ;;  %v586_v1 = vrot.slane %v573_v40, %v585_v62  ;;  %v2668_v40 = vld [vmem:[#allocation7 + $0x10] sm:$0xff]  }
 0x1d6   : > { %1106 = vmatpush1.bf16.msra.mxu0 %v2054_v8  ;;  %1137 = vmatprep.mubr.bf16.mxu0 %v2367_v12  ;;  %v1795_v46 = vunpack.c.l.bf16 %v2668_v40 }
 0x1d7   : > { %1107 = vmatprep.subr.bf16.mxu0 %v2061_v9  ;;  %1879 = vmatpush3.bf16.msra.mxu1 %v2095_v23  ;;  %v2368_v9 = vmov 1966171168   ;;  %v2658_v23 = vld [vmem:[#allocation7 + $0x8] sm:$0xff]  }
 0x1d8   : > { %v1228_v10 = vunpack.c.l.s4 %v2368_v9 }
 0x1da   : > { %1108 = vmatpush1.bf16.msra.mxu0 %v2059_v11  ;;  %1881 = vmatmul.mubr.bf16.vlgmr.msra.gmra.mrb[4].mxu1 %v927_v27 }
 0x1db   : > { %1109 = vmatprep.subr.bf16.mxu0 %v2066_v13 }
 0x1de   : > { %1110 = vmatpush1.bf16.msra.mxu0 %v2064_v15  ;;  %v1229_v15 = vunpack.c.0.s8 %v1228_v10 }
 0x1df   : > { %1111 = vmatprep.subr.bf16.mxu0 %v2071_v16 }
 0x1e2   : > { %1112 = vmatpush1.bf16.msra.mxu0 %v2069_v18  ;;  %v1232_v18 = vsub.s32 %v1229_v15, %v576_v37 }
 0x1e3   : > { %1113 = vmatprep.subr.bf16.mxu0 %v2076_v19 }
 0x1e6   : > { %1114 = vmatpush1.bf16.msra.mxu0 %v2074_v21 }
 0x1e7   : > { %1115 = vmatprep.subr.bf16.mxu0 %v2081_v22 }
 0x1ea   : > { %1116 = vmatpush1.bf16.msra.mxu0 %v2079_v25  ;;  %v1787_v25 = vunpack.c.l.bf16 %v2656_v20 }
 0x1eb   : > { %1117 = vmatprep.subr.bf16.mxu0 %v2084_v26 }
 0x1ee   : > { %1118 = vmatpush1.bf16.msra.mxu0 %v2082_v28 }
 0x1ef   : > { %1119 = vmatprep.subr.bf16.mxu0 %v2088_v29  ;;  %v1791_v29 = vunpack.c.l.bf16 %v2658_v23 }
 0x1f2   : > { %1120 = vmatpush1.bf16.msra.mxu0 %v2086_v30 }
 0x1f5   : > { %1138 = vmatmul.mubr.bf16.vlgmr.msra.gmra.mrb[0].mxu0 %v927_v27 }
 0x28d   : > { %v1829_v31 = vpop.f32.mrb[0].mxu1 }
 0x28e   : > { %v1830_v32 = vpop.f32.mrb[1].mxu1 }
 0x28f   : > { %v1831_v33 = vadd.f32 %v1830_v32, %v1829_v31  ;;  %v1832_v34 = vpop.f32.mrb[2].mxu1  ;;  %v1788_v32 = vunpack.c.h.bf16 %v2656_v20 }
 0x290   : > { %v1833_v35 = vpop.f32.mrb[3].mxu1 }
 0x291   : > { %v922_v5 = vadd.f32 %v1831_v33, %v586_v1 }
 0x2ad   : > { %v1180_v39 = vpop.f32.mrb[4].mxu1 }
 0x2ae   : > { %v1882_v42 = vpop.f32.mrb[5].mxu1  ;;  %v1181_v3 = vadd.f32 %v1180_v39, %v973_v63 }
 0x2af   : > { %v1183_v43 = vpop.f32.mrb[6].mxu1  ;;  %v1792_v42 = vunpack.c.h.bf16 %v2658_v23 }
 0x2b0   : > { %v1883_v45 = vpop.f32.mrb[7].mxu1 }
 0x2c8   : > { %v1139_v51 = vpop.f32.mrb[0].mxu0 }
 0x2c9   : > { %v1885_v53 = vadd.f32 %v1884_v50, %v1139_v51  ;;  %v1141_v54 = vpop.f32.mrb[1].mxu0  ;;  %v1796_v51 = vunpack.c.h.bf16 %v2668_v40 }
 0x2ca   : > { %v1143_v55 = vpop.f32.mrb[2].mxu0  ;;  %v1887_v58 = vadd.f32 %v1886_v52, %v1141_v54 }
 0x2cb   : > { %v1775_v56 = vmul.f32 -1.442695, %v1885_v53  ;;  %v1144_v57 = vpop.f32.mrb[3].mxu0  ;;  %v1799_v55 = vunpack.c.l.bf16 %v2678_v49 }
 0x2cc   : > { %v1776_v59 = vmul.f32 -1.442695, %v1887_v58  ;;  %v1800_v58 = vunpack.c.h.bf16 %v2678_v49 }
 0x2cd   : > { %2096 = vpow2.f32 %v1775_v56 }
 0x2ce   : > { %2098 = vpow2.f32 %v1776_v59 }
 0x2d7   : > { %v2097_v60 = vpop.eup %2096 }
 0x2d8   : > { %v1190_v61 = vadd.f32 1.0, %v2097_v60  ;;  %v2099_v0 = vpop.eup %2098 }
 0x2d9   : > { %v1197_v2 = vadd.f32 1.0, %v2099_v0 }
 0x2da   : > { %2100 = vrcp.f32 %v1190_v61 }
 0x2db   : > { %2102 = vrcp.f32 %v1197_v2 }
 0x2e4   : > { %v2101_v4 = vpop.eup %2100 }
 0x2e5   : > { %v1200_v6 = vmul.f32 %v2101_v4, %v1181_v3  ;;  %v2103_v8 = vpop.eup %2102 }
 0x2e6   : > { %v1203_v11 = vsub.f32 1.0, %v2103_v8  ;;  %v1205_v14 = vmul.f32 %v2103_v8, %v2636_v24 }
 0x2e7   : > { %v1201_v7 = vadd.f32 %v1200_v6, %v922_v5 }
 0x2e9   : > { %2104 = vtanh.f32 %v1201_v7 }
 0x2f3   : > { %v2105_v12 = vpop.eup %2104 }
 0x2f4   : > { %v1204_v13 = vmul.f32 %v2105_v12, %v1203_v11 }
 0x2f6   : > { %v2651_v16 = vadd.f32 %v1205_v14, %v1204_v13 }
 0x2f8   : > { %v1223_v17 = vpack.c.bf16 %v2651_v16, %v2651_v16  ;;  %1531 = vst [vmem:[#allocation2] sm:$0xff] %v2651_v16 }
 0x2fa   : > { %v1224_v19 = vunpack.c.l.bf16 %v1223_v17 }
 0x2fc   : > { %v1233_v21 = vrot.slane %v1224_v19, %v1232_v18  ;;  %v1226_v22 = vcombine.high %v1224_v19, %v1224_v19 }
 0x2fe   : > { %v1249_v26 = vrot.slane %v1233_v21, %v1232_v18  ;;  %v1241_v24 = vcombine.high %v1233_v21, %v1233_v21  ;;  %v1240_v27 = vrot.slane %v1226_v22, %v1232_v18 }
 0x300   : > { %v1278_v28 = vrot.slane %v1249_v26, %v2640_v38  ;;  %v1271_v30 = vcombine.high %v1249_v26, %v1249_v26  ;;  %v1263_v31 = vrot.slane %v1241_v24, %v1232_v18  ;;  %v1256_v33 = vrot.slane %v1240_v27, %v1232_v18 }
 0x301   : > { %v1242_v34 = vcombine.high %v1240_v27, %v1240_v27 }
 0x302   : > { %v1315_v35 = vmul.f32 %v1787_v25, %v1278_v28  ;;  %v1286_v36 = vrot.slane %v1271_v30, %v2640_v38  ;;  %v1282_v37 = vrot.slane %v1263_v31, %v2640_v38  ;;  %v1273_v39 = vcombine.high %v1263_v31, %v1263_v31 }
 0x303   : > { %v1270_v44 = vrot.slane %v1242_v34, %v1232_v18  ;;  %v1294_v47 = vrot.slane %v1256_v33, %v2640_v38  ;;  %v1272_v48 = vcombine.high %v1256_v33, %v1256_v33 }
 0x304   : > { %1323 = vadd.xlane.f32.xlu0 %v1315_v35  ;;  %v1317_v41 = vmul.f32 %v1791_v29, %v1286_v36  ;;  %v1290_v43 = vrot.slane %v1273_v39, %v2640_v38  ;;  %v1316_v45 = vmul.f32 %v1788_v32, %v1282_v37 }
 0x305   : > { %v1298_v52 = vrot.slane %v1270_v44, %v2640_v38  ;;  %v1274_v53 = vcombine.high %v1270_v44, %v1270_v44  ;;  %v1319_v54 = vmul.f32 %v1795_v46, %v1294_v47  ;;  %v1302_v56 = vrot.slane %v1272_v48, %v2640_v38 }
 0x306   : > { %1327 = vadd.xlane.f32.xlu1 %v1317_v41  ;;  %v1318_v50 = vmul.f32 %v1792_v42, %v1290_v43 }
 0x307   : > { %v1320_v57 = vmul.f32 %v1796_v51, %v1298_v52  ;;  %v1306_v59 = vrot.slane %v1274_v53, %v2640_v38  ;;  %v1321_v60 = vmul.f32 %v1799_v55, %v1302_v56 }
 0x308   : > { %1325 = vadd.xlane.f32.xlu0 %v1316_v45 }
 0x309   : > { %v1322_v61 = vmul.f32 %v1800_v58, %v1306_v59 }
 0x30a   : > { %1329 = vadd.xlane.f32.xlu1 %v1318_v50 }
 0x30c   : > { %1331 = vadd.xlane.f32.xlu0 %v1319_v54 }
 0x30e   : > { %1333 = vadd.xlane.f32.xlu1 %v1320_v57 }
 0x310   : > { %1335 = vadd.xlane.f32.xlu0 %v1321_v60 }
 0x312   : > { %1337 = vadd.xlane.f32.xlu1 %v1322_v61 }
 0x391   : > { %v1324_v62 = vpop.xlane.xlu0 %1323 }
 0x392   : > { %v1339_v63 = vrot.slane %v1324_v62, 4 }
 0x393   : > { %v1328_v0 = vpop.xlane.xlu1 %1327 }
 0x394   : > { %v1340_v1 = vmax.f32 %v1324_v62, %v1339_v63  ;;  %v1351_v2 = vrot.slane %v1328_v0, 4 }
 0x395   : > { %v1326_v3 = vpop.xlane.xlu0 %1325 }
 0x396   : > { %v1341_v4 = vrot.slane %v1340_v1, 2  ;;  %v1352_v5 = vmax.f32 %v1328_v0, %v1351_v2  ;;  %v1345_v6 = vrot.slane %v1326_v3, 4 }
 0x397   : > { %v1330_v7 = vpop.xlane.xlu1 %1329 }
 0x398   : > { %v1342_v38 = vmax.f32 %v1340_v1, %v1341_v4  ;;  %v1353_v8 = vrot.slane %v1352_v5, 2  ;;  %v1346_v9 = vmax.f32 %v1326_v3, %v1345_v6  ;;  %v1357_v10 = vrot.slane %v1330_v7, 4 }
 0x399   : > { %v1332_v11 = vpop.xlane.xlu0 %1331 }
 0x39a   : > { %v1343_v12 = vrot.slane %v1342_v38, 1  ;;  %v1354_v13 = vmax.f32 %v1352_v5, %v1353_v8  ;;  %v1347_v14 = vrot.slane %v1346_v9, 2  ;;  %v1358_v15 = vmax.f32 %v1330_v7, %v1357_v10 }
 0x39b   : > { %v1363_v17 = vrot.slane %v1332_v11, 4  ;;  %v1334_v18 = vpop.xlane.xlu1 %1333 }
 0x39c   : > { %v1344_v19 = vmax.f32 %v1342_v38, %v1343_v12  ;;  %v1355_v21 = vrot.slane %v1354_v13, 1  ;;  %v1348_v22 = vmax.f32 %v1346_v9, %v1347_v14  ;;  %v1359_v26 = vrot.slane %v1358_v15, 2 }
 0x39d   : > { %v1364_v24 = vmax.f32 %v1332_v11, %v1363_v17  ;;  %v1369_v27 = vrot.slane %v1334_v18, 4  ;;  %v1336_v28 = vpop.xlane.xlu0 %1335 }
 0x39e   : > { %v1387_v30 = vsub.f32 %v1324_v62, %v1344_v19  ;;  %v1356_v31 = vmax.f32 %v1354_v13, %v1355_v21  ;;  %v1349_v33 = vrot.slane %v1348_v22, 1  ;;  %v1360_v34 = vmax.f32 %v1358_v15, %v1359_v26 }
 0x39f   : > { %v1365_v35 = vrot.slane %v1364_v24, 2  ;;  %v1370_v36 = vmax.f32 %v1334_v18, %v1369_v27  ;;  %v1375_v37 = vrot.slane %v1336_v28, 4  ;;  %v1338_v39 = vpop.xlane.xlu1 %1337 }
 0x3a0   : > { %v1395_v41 = vmul.f32 1.442695, %v1387_v30  ;;  %v1389_v43 = vsub.f32 %v1328_v0, %v1356_v31  ;;  %v1350_v44 = vmax.f32 %v1348_v22, %v1349_v33  ;;  %v1361_v45 = vrot.slane %v1360_v34, 1 }
 0x3a1   : > { %v1366_v47 = vmax.f32 %v1364_v24, %v1365_v35  ;;  %v1371_v48 = vrot.slane %v1370_v36, 2  ;;  %v1376_v50 = vmax.f32 %v1336_v28, %v1375_v37  ;;  %v1381_v52 = vrot.slane %v1338_v39, 4 }
 0x3a2   : > { %2106 = vpow2.f32 %v1395_v41  ;;  %v1399_v53 = vmul.f32 1.442695, %v1389_v43  ;;  %v1388_v54 = vsub.f32 %v1326_v3, %v1350_v44  ;;  %v1362_v56 = vmax.f32 %v1360_v34, %v1361_v45 }
 0x3a3   : > { %v1367_v57 = vrot.slane %v1366_v47, 1  ;;  %v1372_v59 = vmax.f32 %v1370_v36, %v1371_v48  ;;  %v1377_v60 = vrot.slane %v1376_v50, 2  ;;  %v1382_v61 = vmax.f32 %v1338_v39, %v1381_v52 }
 0x3a4   : > { %2108 = vpow2.f32 %v1399_v53  ;;  %v1397_v62 = vmul.f32 1.442695, %v1388_v54  ;;  %v1390_v63 = vsub.f32 %v1330_v7, %v1362_v56 }
 0x3a5   : > { %v1368_v1 = vmax.f32 %v1366_v47, %v1367_v57  ;;  %v1373_v2 = vrot.slane %v1372_v59, 1  ;;  %v1378_v0 = vmax.f32 %v1376_v50, %v1377_v60  ;;  %v1383_v4 = vrot.slane %v1382_v61, 2 }
 0x3a6   : > { %2110 = vpow2.f32 %v1397_v62  ;;  %v1401_v5 = vmul.f32 1.442695, %v1390_v63 }
 0x3a7   : > { %v1391_v6 = vsub.f32 %v1332_v11, %v1368_v1  ;;  %v1374_v38 = vmax.f32 %v1372_v59, %v1373_v2  ;;  %v1379_v8 = vrot.slane %v1378_v0, 1  ;;  %v1384_v9 = vmax.f32 %v1382_v61, %v1383_v4 }
 0x3a8   : > { %2112 = vpow2.f32 %v1401_v5 }
 0x3a9   : > { %v1403_v3 = vmul.f32 1.442695, %v1391_v6  ;;  %v1392_v10 = vsub.f32 %v1334_v18, %v1374_v38  ;;  %v1380_v12 = vmax.f32 %v1378_v0, %v1379_v8  ;;  %v1385_v13 = vrot.slane %v1384_v9, 1 }
 0x3ab   : > { %2114 = vpow2.f32 %v1403_v3  ;;  %v1405_v14 = vmul.f32 1.442695, %v1392_v10  ;;  %v1393_v15 = vsub.f32 %v1336_v28, %v1380_v12  ;;  %v1386_v17 = vmax.f32 %v1384_v9, %v1385_v13 }
 0x3ac   : > { %v2696_v7 = vpop.eup %2106 }
 0x3ad   : > { %v1411_v19 = vrot.slane %v2696_v7, 4  ;;  %2116 = vpow2.f32 %v1405_v14  ;;  %v1407_v21 = vmul.f32 1.442695, %v1393_v15  ;;  %v1394_v22 = vsub.f32 %v1338_v39, %v1386_v17 }
 0x3ae   : > { %v2699_v11 = vpop.eup %2108 }
 0x3af   : > { %v1412_v26 = vadd.f32 %v2696_v7, %v1411_v19  ;;  %v1423_v24 = vrot.slane %v2699_v11, 4  ;;  %2118 = vpow2.f32 %v1407_v21  ;;  %v1409_v18 = vmul.f32 1.442695, %v1394_v22 }
 0x3b0   : > { %v2703_v27 = vpop.eup %2110 }
 0x3b1   : > { %v1413_v30 = vrot.slane %v1412_v26, 2  ;;  %v1424_v28 = vadd.f32 %v2699_v11, %v1423_v24  ;;  %v1417_v31 = vrot.slane %v2703_v27, 4  ;;  %2120 = vpow2.f32 %v1409_v18 }
 0x3b2   : > { %v2707_v33 = vpop.eup %2112 }
 0x3b3   : > { %v1414_v34 = vadd.f32 %v1413_v30, %v1412_v26  ;;  %v1425_v35 = vrot.slane %v1424_v28, 2  ;;  %v1418_v36 = vadd.f32 %v2703_v27, %v1417_v31  ;;  %v1429_v37 = vrot.slane %v2707_v33, 4 }
 0x3b5   : > { %v2711_v39 = vpop.eup %2114  ;;  %v1415_v41 = vrot.slane %v1414_v34, 1  ;;  %v1426_v43 = vadd.f32 %v1425_v35, %v1424_v28  ;;  %v1419_v44 = vrot.slane %v1418_v36, 2  ;;  %v1430_v45 = vadd.f32 %v2707_v33, %v1429_v37 }
 0x3b6   : > { %v1435_v47 = vrot.slane %v2711_v39, 4 }
 0x3b7   : > { %v2715_v48 = vpop.eup %2116  ;;  %v1416_v50 = vadd.f32 %v1415_v41, %v1414_v34  ;;  %v1427_v52 = vrot.slane %v1426_v43, 1  ;;  %v1420_v53 = vadd.f32 %v1419_v44, %v1418_v36  ;;  %v1431_v54 = vrot.slane %v1430_v45, 2 }
 0x3b8   : > { %v1436_v56 = vadd.f32 %v2711_v39, %v1435_v47  ;;  %v1441_v57 = vrot.slane %v2715_v48, 4 }
 0x3b9   : > { %v2719_v59 = vpop.eup %2118  ;;  %2122 = vrcp.f32 %v1416_v50  ;;  %v1428_v60 = vadd.f32 %v1427_v52, %v1426_v43  ;;  %v1421_v61 = vrot.slane %v1420_v53, 1  ;;  %v1432_v62 = vadd.f32 %v1431_v54, %v1430_v45 }
 0x3ba   : > { %v1437_v63 = vrot.slane %v1436_v56, 2  ;;  %v1442_v1 = vadd.f32 %v2715_v48, %v1441_v57  ;;  %v1447_v2 = vrot.slane %v2719_v59, 4 }
 0x3bb   : > { %v2723_v0 = vpop.eup %2120  ;;  %2124 = vrcp.f32 %v1428_v60  ;;  %v1422_v4 = vadd.f32 %v1421_v61, %v1420_v53  ;;  %v1433_v5 = vrot.slane %v1432_v62, 1 }
 0x3bc   : > { %v1438_v6 = vadd.f32 %v1437_v63, %v1436_v56  ;;  %v1443_v38 = vrot.slane %v1442_v1, 2  ;;  %v1448_v8 = vadd.f32 %v2719_v59, %v1447_v2  ;;  %v1453_v9 = vrot.slane %v2723_v0, 4 }
 0x3bd   : > { %2126 = vrcp.f32 %v1422_v4  ;;  %v1434_v3 = vadd.f32 %v1433_v5, %v1432_v62 }
 0x3be   : > { %v1439_v10 = vrot.slane %v1438_v6, 1  ;;  %v1444_v12 = vadd.f32 %v1443_v38, %v1442_v1  ;;  %v1449_v13 = vrot.slane %v1448_v8, 2  ;;  %v1454_v14 = vadd.f32 %v2723_v0, %v1453_v9 }
 0x3bf   : > { %2128 = vrcp.f32 %v1434_v3 }
 0x3c0   : > { %v1440_v15 = vadd.f32 %v1439_v10, %v1438_v6  ;;  %v1445_v17 = vrot.slane %v1444_v12, 1  ;;  %v1450_v19 = vadd.f32 %v1449_v13, %v1448_v8  ;;  %v1455_v21 = vrot.slane %v1454_v14, 2 }
 0x3c2   : > { %2130 = vrcp.f32 %v1440_v15  ;;  %v1446_v22 = vadd.f32 %v1445_v17, %v1444_v12  ;;  %v1451_v26 = vrot.slane %v1450_v19, 1  ;;  %v1456_v24 = vadd.f32 %v1455_v21, %v1454_v14 }
 0x3c3   : > { %v2123_v18 = vpop.eup %2122 }
 0x3c4   : > { %v1467_v30 = vmul.f32 %v2123_v18, %v2696_v7  ;;  %v1452_v28 = vadd.f32 %v1451_v26, %v1450_v19  ;;  %v1457_v31 = vrot.slane %v1456_v24, 1  ;;  %2132 = vrcp.f32 %v1446_v22 }
 0x3c5   : > { %v2125_v34 = vpop.eup %2124 }
 0x3c6   : > { %v1458_v35 = vadd.f32 %v1457_v31, %v1456_v24  ;;  %2134 = vrcp.f32 %v1452_v28  ;;  %v1469_v36 = vmul.f32 %v2125_v34, %v2699_v11  ;;  %v1475_v37 = vmul.f32 %v1787_v25, %v1467_v30 }
 0x3c7   : > { %v2127_v41 = vpop.eup %2126 }
 0x3c8   : > { %v1468_v43 = vmul.f32 %v2127_v41, %v2703_v27  ;;  %2136 = vrcp.f32 %v1458_v35  ;;  %v1477_v44 = vmul.f32 %v1791_v29, %v1469_v36  ;;  %v1483_v45 = vrot.slane %v1475_v37, 4 }
 0x3c9   : > { %v2129_v7 = vpop.eup %2128 }
 0x3ca   : > { %v1470_v47 = vmul.f32 %v2129_v7, %v2707_v33  ;;  %v1476_v50 = vmul.f32 %v1788_v32, %v1468_v43  ;;  %v1484_v52 = vadd.f32 %v1483_v45, %v1475_v37  ;;  %v1495_v53 = vrot.slane %v1477_v44, 4 }
 0x3cc   : > { %v2131_v11 = vpop.eup %2130  ;;  %v1478_v25 = vmul.f32 %v1792_v42, %v1470_v47  ;;  %v1485_v54 = vrot.slane %v1484_v52, 2  ;;  %v1489_v56 = vrot.slane %v1476_v50, 4  ;;  %v1496_v27 = vadd.f32 %v1495_v53, %v1477_v44 }
 0x3cd   : > { %v1471_v57 = vmul.f32 %v2131_v11, %v2711_v39 }
 0x3ce   : > { %v2133_v60 = vpop.eup %2132  ;;  %v1486_v29 = vadd.f32 %v1485_v54, %v1484_v52  ;;  %v1490_v61 = vadd.f32 %v1489_v56, %v1476_v50  ;;  %v1497_v62 = vrot.slane %v1496_v27, 2  ;;  %v1501_v63 = vrot.slane %v1478_v25, 4 }
 0x3cf   : > { %v1472_v33 = vmul.f32 %v2133_v60, %v2715_v48  ;;  %v1479_v20 = vmul.f32 %v1795_v46, %v1471_v57 }
 0x3d0   : > { %v2135_v32 = vpop.eup %2134  ;;  %v1491_v1 = vrot.slane %v1490_v61, 2  ;;  %v1498_v2 = vadd.f32 %v1497_v62, %v1496_v27  ;;  %v1502_v23 = vadd.f32 %v1501_v63, %v1478_v25  ;;  %v1487_v6 = vrot.slane %v1486_v29, 1 }
 0x3d1   : > { %v1473_v42 = vmul.f32 %v2135_v32, %v2719_v59  ;;  %v1480_v4 = vmul.f32 %v1796_v51, %v1472_v33  ;;  %v1507_v39 = vrot.slane %v1479_v20, 4 }
 0x3d2   : > { %v2137_v5 = vpop.eup %2136  ;;  %v1492_v38 = vadd.f32 %v1491_v1, %v1490_v61  ;;  %v1503_v8 = vrot.slane %v1502_v23, 2  ;;  %v1499_v12 = vrot.slane %v1498_v2, 1  ;;  %v1488_v15 = vadd.f32 %v1487_v6, %v1486_v29 }
 0x3d3   : > { %v1474_v9 = vmul.f32 %v2137_v5, %v2723_v0  ;;  %v1481_v48 = vmul.f32 %v1799_v55, %v1473_v42  ;;  %v1508_v46 = vadd.f32 %v1507_v39, %v1479_v20  ;;  %v1513_v3 = vrot.slane %v1480_v4, 4 }
 0x3d4   : > { %v1493_v10 = vrot.slane %v1492_v38, 1  ;;  %v1504_v13 = vadd.f32 %v1503_v8, %v1502_v23  ;;  %v1500_v26 = vadd.f32 %v1499_v12, %v1498_v2 }
 0x3d5   : > { %v1482_v40 = vmul.f32 %v1800_v58, %v1474_v9  ;;  %v1509_v51 = vrot.slane %v1508_v46, 2  ;;  %v1514_v59 = vadd.f32 %v1513_v3, %v1480_v4  ;;  %v1519_v14 = vrot.slane %v1481_v48, 4 }
 0x3d6   : > { %v1494_v17 = vadd.f32 %v1493_v10, %v1492_v38  ;;  %v1505_v19 = vrot.slane %v1504_v13, 1 }
 0x3d7   : > { %v1510_v0 = vadd.f32 %v1509_v51, %v1508_v46  ;;  %v1515_v21 = vrot.slane %v1514_v59, 2  ;;  %v1520_v22 = vadd.f32 %v1519_v14, %v1481_v48  ;;  %v1525_v55 = vrot.slane %v1482_v40, 4 }
 0x3d8   : > { %v1506_v24 = vadd.f32 %v1505_v19, %v1504_v13  ;;  %v1541_v18 = vsel %vm1540_vm2, %v1494_v17, %v1488_v15 }
 0x3d9   : > { %v1511_v30 = vrot.slane %v1510_v0, 1  ;;  %v1516_v28 = vadd.f32 %v1515_v21, %v1514_v59  ;;  %v1521_v31 = vrot.slane %v1520_v22, 2  ;;  %v1526_v49 = vadd.f32 %v1525_v55, %v1482_v40 }
 0x3da   : > { %v1543_v58 = vsel %vm1542_vm3, %v1500_v26, %v1541_v18 }
 0x3db   : > { %v1512_v34 = vadd.f32 %v1511_v30, %v1510_v0  ;;  %v1517_v35 = vrot.slane %v1516_v28, 1  ;;  %v1522_v36 = vadd.f32 %v1521_v31, %v1520_v22  ;;  %v1527_v37 = vrot.slane %v1526_v49, 2 }
 0x3dc   : > { %v1545_v41 = vsel %vm1544_vm4, %v1506_v24, %v1543_v58 }
 0x3dd   : > { %v1518_v43 = vadd.f32 %v1517_v35, %v1516_v28  ;;  %v1523_v44 = vrot.slane %v1522_v36, 1  ;;  %v1528_v45 = vadd.f32 %v1527_v37, %v1526_v49  ;;  %v1547_v7 = vsel %vm1546_vm5, %v1512_v34, %v1545_v41 }
 0x3df   : > { %v1524_v47 = vadd.f32 %v1523_v44, %v1522_v36  ;;  %v1529_v50 = vrot.slane %v1528_v45, 1  ;;  %v1549_v52 = vsel %vm1548_vm6, %v1518_v43, %v1547_v7 }
 0x3e1   : > { %v1530_v53 = vadd.f32 %v1529_v50, %v1528_v45  ;;  %v1551_v11 = vsel %vm1550_vm7, %v1524_v47, %v1549_v52 }
 0x3e3   : > { %v1553_v25 = vsel %vm1552_vm8, %v1530_v53, %v1551_v11 }
 0x3e4   : > { %1555 = vst [vmem:[#allocation3] sm:$0xff] %v1553_v25  ;;  %v1783_v54 = vpack.c.bf16 %v2651_v16, %v1553_v25 }
 0x3e6   : > { %1563 = vst [vmem:[%s383_s17] sm:$0xff] %v1783_v54 }
 0x3e7   : > { %2291 = shalt.err (!%p2288_p1)
}
 0x3e8   : > { %s2292_s21 = scalar_lea.hbm %s2759_s29, 128  ;;  %s2296_s18 = scalar_lea.hbm %s2814_s9, 1024 }
 0x3e9   : > { %p2293_p6 = scmp.ne.s32.totalorder %s2759_s29, %s2292_s21  ;;  %p2297_p11 = scmp.lt.u32.totalorder %s2759_s29, %s2814_s9 }
 0x3ea   : > { %p2298_p13 = scmp.lt.u32.totalorder %s2296_s18, %s2292_s21  ;;  %p2300_p2 = scmp.lt.u32.totalorder %s2292_s21, %s2759_s29 }
 0x3eb   : > { %p2294_p9 = pnand %p2293_p6, %p2851_p3 }
 0x3ec   : > { %p2299_p0 = por %p2298_p13, %p2297_p11 }
 0x3ed   : > { %p2295_p10 = pneg %p2294_p9 }
 0x3ee   : > { %p2301_p4 = por %p2300_p2, %p2299_p0 }
 0x3f0   : > { %p2302_p7 = pnand %p2301_p4, %p2295_p10 }
 0x3f2   : > { %2305 = shalt.err (!%p2302_p7)
}
 0x3f3   : > { %1912 = dma.vmem_to_hbm [thread:$0]  (%p2851_p3), %s2761_s14, 128, %s2759_s29, %s1565_s13  }
 0x3f4 PF: > { %s2852_s16 = sld [smem:[#allocation21_spill]]  ;;  %p1944_p8 = scmp.ge.s32.totalorder %s2352_s12, 2 }
 0x3f5   : > { %s1591_s25 = sand.u32 1, %s2340_s30  }
 0x3f6   : > { %s1592_s1 = scalar_lea.sflag [#allocation6], %s1591_s25 }
 0x3fa   : > { %p2853_p12 = scmp.ne.s32.totalorder %s2852_s16, 0 }
 0x3fc   : > { %p1931_p5 = pnand %p1944_p8, %p2853_p12 }
 0x3fe   : > { %2335 = dma.done.wait (!%p1931_p5), %s1592_s1, 128  }
 0x3ff   : > { %2337 = vsyncadd (!%p1931_p5), %s1592_s1, 4294967168  ;;  %s2854_s12 = sld [smem:[#allocation19_spill]]  ;;  %s2855_s15 = sld [smem:[#allocation18_spill]] }
 0x400   : > { %s2856_s11 = sld [smem:[#allocation20_spill]]  ;;  %s2857_s30 = smov %s2344_s10 }
 0x405   : > { %p22_p1 = scmp.ge.s32.totalorder %s2854_s12, 10   ;;  %s2858_s10 = smov %s2855_s15 }
 0x407   :  { %24 = sbr.rel (!%p22_p1) target bundleno = 8 (0x8), region = 114 }
 0x40e   :  { %1597 = vsyncpa [#allocation5], 1 }
 0x40f   :  { %1599 = vsyncpa [#allocation5 + $0x1], 1 }
 0x410   :  { %1600 = vsyncpa [#allocation8], 1 }
 0x411   :  { %1601 = vsyncpa [#allocation11], 1 }
 0x412   :  { %1602 = vsyncpa [#allocation6], 1 }
 0x413   :  { %1604 = vsyncpa [#allocation6 + $0x1], 1 }

</bundles_post_ra>
